<compile_context>
chip_gen: v7x
topology: tpu7x:2x2x1
jax: 0.10.0
libtpu: 0.0.40
codegen_flags: <defaults>
</compile_context>

<pallas_src>
import math

import jax
import jax.numpy as jnp
from jax import lax
from jax.experimental import pallas as pl
from jax.experimental.pallas import tpu as pltpu

# ----- small synthetic GPT-2 config ------------------------------------------
B = 2            # batch of sequences
VOCAB = 128      # vocab size (tiny, synthetic; multiple of 128 -> lane-dense)
MAX_POS = 16     # max positions
SEQ = 8          # sequence length
D = 32           # hidden size
H = 4            # attention heads
HD = D // H      # head dim
MLP = 4 * D      # MLP inner dim
L = 2            # number of transformer blocks
EPS = 1e-5       # GPT-2 LayerNorm eps

# Whole batch in one grid step on v5e/v6e (single TensorCore); on v7x use
# BLOCK_B = B // 2 so each of the two TensorCores takes one block.
BLOCK_B = B
BS = BLOCK_B * SEQ    # tokens per grid step
BH = BLOCK_B * H      # (sequence, head) pairs per grid step


def _layer_norm(x, g, b):
    mu = jnp.mean(x, axis=-1, keepdims=True)
    var = jnp.mean((x - mu) ** 2, axis=-1, keepdims=True)
    return (x - mu) * lax.rsqrt(var + EPS) * g + b


def _gelu_new(x):
    # GPT-2 uses the tanh ("new") GELU approximation.
    c = math.sqrt(2.0 / math.pi)
    return 0.5 * x * (1.0 + jnp.tanh(c * (x + 0.044715 * x * x * x)))


def gpt2_kernel(x_ref, nb_ref, wqkv_ref, bqkv_ref, wproj_ref,
                wfc_ref, bfc_ref, wout_ref, lnf_ref, wte_t_ref,
                logits_ref):
    # All tokens of the batch block on the sublane axis: [BS, D].
    x = x_ref[...].reshape(BS, D)

    # Hoisted additive causal mask (identical for every (sequence, head) pair;
    # attention is batched per (sequence, head), so no cross-sequence leak).
    row = lax.broadcasted_iota(jnp.int32, (SEQ, SEQ), 0)
    col = lax.broadcasted_iota(jnp.int32, (SEQ, SEQ), 1)
    neg_mask = jnp.where(col <= row, 0.0, -1e9)[None]        # [1, SEQ, SEQ]

    dn_qk = (((2,), (2,)), ((0,), (0,)))   # [BH,S,HD] x [BH,S,HD] -> [BH,S,S]
    dn_av = (((2,), (1,)), ((0,), (0,)))   # [BH,S,S]  x [BH,S,HD] -> [BH,S,HD]

    def split_heads(t2d):
        # [BS, D] -> [BH, SEQ, HD]; axis-0 index is h * BLOCK_B + b.
        t3 = t2d.reshape(BLOCK_B, SEQ, D)                    # layout-preserving
        return jnp.concatenate(
            [t3[:, :, h * HD:(h + 1) * HD] for h in range(H)], axis=0)

    def merge_heads(t3d):
        # [BH, SEQ, HD] -> [BS, D] in GPT-2 head-major column order.
        heads = [t3d[h * BLOCK_B:(h + 1) * BLOCK_B] for h in range(H)]
        return jnp.concatenate(heads, axis=-1).reshape(BS, D)

    for l in range(L):                                       # static unrolled (L=2)
        nb = nb_ref[l]                                       # [6, D]
        ln1_g, ln1_b = nb[0:1], nb[1:2]
        ln2_g, ln2_b = nb[2:3], nb[3:4]
        bproj, bout = nb[4:5], nb[5:6]

        # ---- multi-head causal self-attention --------------------------------
        h1 = _layer_norm(x, ln1_g, ln1_b)                    # [BS, D]
        # One dense, 96-lane-wide QKV matmul; 1/sqrt(HD) pre-folded into the
        # Q columns of wqkv / bqkv on the host.
        qkv = jnp.dot(h1, wqkv_ref[l],
                      preferred_element_type=jnp.float32) + bqkv_ref[l]   # [BS, 3D]

        q = split_heads(qkv[:, 0 * D:1 * D])
        k = split_heads(qkv[:, 1 * D:2 * D])
        v = split_heads(qkv[:, 2 * D:3 * D])

        s = lax.dot_general(q, k, dn_qk, preferred_element_type=jnp.float32)
        s = s + neg_mask                                     # causal
        s = s - jnp.max(s, axis=-1, keepdims=True)
        p = jnp.exp(s)
        p = p / jnp.sum(p, axis=-1, keepdims=True)           # exact normalisation

        o = lax.dot_general(p, v, dn_av, preferred_element_type=jnp.float32)

        # One dense K=32 output projection on merged heads.
        attn = jnp.dot(merge_heads(o), wproj_ref[l],
                       preferred_element_type=jnp.float32) + bproj
        x = x + attn                                         # residual

        # ---- GELU MLP ---------------------------------------------------------
        h2 = _layer_norm(x, ln2_g, ln2_b)
        m = jnp.dot(h2, wfc_ref[l], preferred_element_type=jnp.float32) + bfc_ref[l]
        m = _gelu_new(m)
        m = jnp.dot(m, wout_ref[l], preferred_element_type=jnp.float32) + bout
        x = x + m                                            # residual

    # ---- final LN + tied LM head (single lane-dense [BS, VOCAB=128] store) ---
    lnf = lnf_ref[...]                                       # [2, D]
    xf = _layer_norm(x, lnf[0:1], lnf[1:2])
    logits = jnp.dot(xf, wte_t_ref[...], preferred_element_type=jnp.float32)
    logits_ref[...] = logits.reshape(BLOCK_B, SEQ, VOCAB)


def init_params(key):
    ks = jax.random.split(key, 8)

    def n(k, shape, std=0.02):
        return (std * jax.random.normal(k, shape)).astype(jnp.float32)

    return dict(
        wte=n(ks[0], (VOCAB, D)),
        wpe=n(ks[1], (MAX_POS, D), std=0.01),
        ln1_g=jnp.ones((L, 1, D), jnp.float32),
        ln1_b=jnp.zeros((L, 1, D), jnp.float32),
        wqkv=n(ks[2], (L, D, 3 * D)),
        bqkv=jnp.zeros((L, 1, 3 * D), jnp.float32),
        wproj=n(ks[3], (L, D, D)),
        bproj=jnp.zeros((L, 1, D), jnp.float32),
        ln2_g=jnp.ones((L, 1, D), jnp.float32),
        ln2_b=jnp.zeros((L, 1, D), jnp.float32),
        wfc=n(ks[4], (L, D, MLP)),
        bfc=jnp.zeros((L, 1, MLP), jnp.float32),
        wout=n(ks[5], (L, MLP, D)),
        bout=jnp.zeros((L, 1, D), jnp.float32),
        lnf_g=jnp.ones((1, D), jnp.float32),
        lnf_b=jnp.zeros((1, D), jnp.float32),
    )


def gpt2_forward(token_ids, params):
    """token_ids: int32 [B, SEQ].  Returns logits f32 [B, SEQ, VOCAB]."""
    # Glue: embedding gather + positional add (plain JAX) and host-side
    # constant folds / packing.
    x = params["wte"][token_ids] + params["wpe"][:SEQ][None]             # [B,SEQ,D]

    nb = jnp.concatenate([params["ln1_g"], params["ln1_b"],
                          params["ln2_g"], params["ln2_b"],
                          params["bproj"], params["bout"]], axis=1)       # [L,6,D]

    # Fold the 1/sqrt(HD) attention scale into the Q columns (host const fold).
    scale_vec = jnp.concatenate(
        [jnp.full((1, D), 1.0 / math.sqrt(HD), jnp.float32),
         jnp.ones((1, 2 * D), jnp.float32)], axis=1)                      # [1, 3D]
    wqkv = params["wqkv"] * scale_vec                                     # [L, D, 3D]
    bqkv = params["bqkv"] * scale_vec                                     # [L, 1, 3D]

    lnf = jnp.concatenate([params["lnf_g"], params["lnf_b"]], axis=0)     # [2, D]
    wte_t = params["wte"].T                                               # [D, VOCAB]

    inputs = [x, nb, wqkv, bqkv, params["wproj"],
              params["wfc"], params["bfc"], params["wout"], lnf, wte_t]

    def full_spec(arr):
        return pl.BlockSpec(arr.shape, lambda i, _nd=arr.ndim: (0,) * _nd)

    in_specs = ([pl.BlockSpec((BLOCK_B, SEQ, D), lambda i: (i, 0, 0))]
                + [full_spec(a) for a in inputs[1:]])

    logits = pl.pallas_call(
        gpt2_kernel,
        out_shape=jax.ShapeDtypeStruct((B, SEQ, VOCAB), jnp.float32),
        grid=(B // BLOCK_B,),
        in_specs=in_specs,
        out_specs=pl.BlockSpec((BLOCK_B, SEQ, VOCAB), lambda i: (i, 0, 0)),
        compiler_params=pltpu.CompilerParams(
            dimension_semantics=("parallel",)),
    )(*inputs)
    return logits


# ---- pure-JAX reference (for correctness check) ------------------------------
def gpt2_ref_single(token_ids, params):
    x = params["wte"][token_ids] + params["wpe"][:SEQ]
    causal = jnp.tril(jnp.ones((SEQ, SEQ), bool))
    for l in range(L):
        h = _layer_norm(x, params["ln1_g"][l], params["ln1_b"][l])
        qkv = h @ params["wqkv"][l] + params["bqkv"][l]
        q, k, v = qkv[:, :D], qkv[:, D:2 * D], qkv[:, 2 * D:]
        outs = []
        for hh in range(H):
            qh = q[:, hh * HD:(hh + 1) * HD]
            kh = k[:, hh * HD:(hh + 1) * HD]
            vh = v[:, hh * HD:(hh + 1) * HD]
            s = qh @ kh.T / math.sqrt(HD)
            s = jnp.where(causal, s, -1e9)
            p = jax.nn.softmax(s, axis=-1)
            outs.append(p @ vh)
        attn = jnp.concatenate(outs, axis=-1) @ params["wproj"][l] + params["bproj"][l]
        x = x + attn
        h2 = _layer_norm(x, params["ln2_g"][l], params["ln2_b"][l])
        m = _gelu_new(h2 @ params["wfc"][l] + params["bfc"][l])
        x = x + (m @ params["wout"][l] + params["bout"][l])
    xf = _layer_norm(x, params["lnf_g"], params["lnf_b"])
    return xf @ params["wte"].T


if __name__ == "__main__":
    key = jax.random.PRNGKey(0)
    pkey, ikey = jax.random.split(key)
    params = init_params(pkey)
    token_ids = jax.random.randint(ikey, (B, SEQ), 0, VOCAB, dtype=jnp.int32)

    logits = gpt2_forward(token_ids, params)
    jax.block_until_ready(logits)

    ref = jax.vmap(lambda t: gpt2_ref_single(t, params))(token_ids)
    assert logits.shape == (B, SEQ, VOCAB)
    # Tight tolerance: all-f32 matmuls and exact softmax normalisation.
    assert jnp.allclose(logits, ref, atol=1e-4, rtol=1e-4), \
        float(jnp.max(jnp.abs(logits - ref)))

    print("KERNEL_OK")
</pallas_src>

<mosaic_0001>
module attributes {stable_mosaic.version = 11 : i64} {
  func.func @gpt2_kernel(%arg0: i32, %arg1: memref<2x8x32xf32, #tpu.memory_space<vmem>>, %arg2: memref<2x6x32xf32, #tpu.memory_space<vmem>>, %arg3: memref<2x32x96xf32, #tpu.memory_space<vmem>>, %arg4: memref<2x1x96xf32, #tpu.memory_space<vmem>>, %arg5: memref<2x32x32xf32, #tpu.memory_space<vmem>>, %arg6: memref<2x32x128xf32, #tpu.memory_space<vmem>>, %arg7: memref<2x1x128xf32, #tpu.memory_space<vmem>>, %arg8: memref<2x128x32xf32, #tpu.memory_space<vmem>>, %arg9: memref<2x32xf32, #tpu.memory_space<vmem>>, %arg10: memref<32x128xf32, #tpu.memory_space<vmem>>, %arg11: memref<2x8x128xf32, #tpu.memory_space<vmem>>) attributes {dimension_semantics = [#tpu.dimension_semantics<parallel>], iteration_bounds = array<i64: 1>, scalar_prefetch = 0 : i64, scratch_operands = 0 : i64, tpu.core_type = #tpu.core_type<tc>, window_params = [{transform_indices = @transform_0, window_bounds = array<i64: 2, 8, 32>}, {pipeline_mode = #tpu.pipeline_mode<synchronous>, transform_indices = @transform_1, window_bounds = array<i64: 2, 6, 32>}, {pipeline_mode = #tpu.pipeline_mode<synchronous>, transform_indices = @transform_2, window_bounds = array<i64: 2, 32, 96>}, {pipeline_mode = #tpu.pipeline_mode<synchronous>, transform_indices = @transform_3, window_bounds = array<i64: 2, 1, 96>}, {pipeline_mode = #tpu.pipeline_mode<synchronous>, transform_indices = @transform_4, window_bounds = array<i64: 2, 32, 32>}, {pipeline_mode = #tpu.pipeline_mode<synchronous>, transform_indices = @transform_5, window_bounds = array<i64: 2, 32, 128>}, {pipeline_mode = #tpu.pipeline_mode<synchronous>, transform_indices = @transform_6, window_bounds = array<i64: 2, 1, 128>}, {pipeline_mode = #tpu.pipeline_mode<synchronous>, transform_indices = @transform_7, window_bounds = array<i64: 2, 128, 32>}, {pipeline_mode = #tpu.pipeline_mode<synchronous>, transform_indices = @transform_8, window_bounds = array<i64: 2, 32>}, {pipeline_mode = #tpu.pipeline_mode<synchronous>, transform_indices = @transform_9, window_bounds = array<i64: 32, 128>}, {transform_indices = @transform_10, window_bounds = array<i64: 2, 8, 128>}]} {
    %c0 = arith.constant 0 : index
    %c0_0 = arith.constant 0 : index
    %c0_1 = arith.constant 0 : index
    %0 = vector.load %arg1[%c0, %c0_0, %c0_1] : memref<2x8x32xf32, #tpu.memory_space<vmem>>, vector<2x8x32xf32>
    %1 = vector.shape_cast %0 : vector<2x8x32xf32> to vector<16x32xf32>
    %2 = tpu.iota {dimensions = array<i32: 0>} : vector<8x8xi32>
    %3 = tpu.iota {dimensions = array<i32: 1>} : vector<8x8xi32>
    %4 = arith.cmpi sle, %3, %2 : vector<8x8xi32>
    %cst = arith.constant 0.000000e+00 : f32
    %cst_2 = arith.constant -1.000000e+09 : f32
    %5 = vector.broadcast %cst : f32 to vector<8x8xf32>
    %6 = vector.broadcast %cst_2 : f32 to vector<8x8xf32>
    %7 = arith.select %4, %5, %6 : vector<8x8xi1>, vector<8x8xf32>
    %8 = vector.shape_cast %7 : vector<8x8xf32> to vector<1x8x8xf32>
    %c0_3 = arith.constant 0 : index
    %c0_4 = arith.constant 0 : index
    %c0_5 = arith.constant 0 : index
    %9 = vector.load %arg2[%c0_3, %c0_4, %c0_5] : memref<2x6x32xf32, #tpu.memory_space<vmem>>, vector<1x6x32xf32>
    %10 = vector.shape_cast %9 : vector<1x6x32xf32> to vector<6x32xf32>
    %11 = vector.extract_strided_slice %10 {offsets = [0, 0], sizes = [1, 32], strides = [1, 1]} : vector<6x32xf32> to vector<1x32xf32>
    %12 = vector.extract_strided_slice %10 {offsets = [1, 0], sizes = [1, 32], strides = [1, 1]} : vector<6x32xf32> to vector<1x32xf32>
    %13 = vector.extract_strided_slice %10 {offsets = [2, 0], sizes = [1, 32], strides = [1, 1]} : vector<6x32xf32> to vector<1x32xf32>
    %14 = vector.extract_strided_slice %10 {offsets = [3, 0], sizes = [1, 32], strides = [1, 1]} : vector<6x32xf32> to vector<1x32xf32>
    %15 = vector.extract_strided_slice %10 {offsets = [4, 0], sizes = [1, 32], strides = [1, 1]} : vector<6x32xf32> to vector<1x32xf32>
    %16 = vector.extract_strided_slice %10 {offsets = [5, 0], sizes = [1, 32], strides = [1, 1]} : vector<6x32xf32> to vector<1x32xf32>
    %cst_6 = arith.constant dense<0.000000e+00> : vector<16xf32>
    %17 = vector.multi_reduction <add>, %1, %cst_6 [1] : vector<16x32xf32> to vector<16xf32>
    %18 = vector.shape_cast %17 : vector<16xf32> to vector<16x1xf32>
    %cst_7 = arith.constant 3.200000e+01 : f32
    %19 = vector.broadcast %cst_7 : f32 to vector<16x1xf32>
    %20 = arith.divf %18, %19 : vector<16x1xf32>
    %21 = vector.broadcast %20 : vector<16x1xf32> to vector<16x32xf32>
    %22 = arith.subf %1, %21 : vector<16x32xf32>
    %23 = arith.mulf %22, %22 : vector<16x32xf32>
    %cst_8 = arith.constant dense<0.000000e+00> : vector<16xf32>
    %24 = vector.multi_reduction <add>, %23, %cst_8 [1] : vector<16x32xf32> to vector<16xf32>
    %25 = vector.shape_cast %24 : vector<16xf32> to vector<16x1xf32>
    %cst_9 = arith.constant 3.200000e+01 : f32
    %26 = vector.broadcast %cst_9 : f32 to vector<16x1xf32>
    %27 = arith.divf %25, %26 : vector<16x1xf32>
    %28 = vector.broadcast %20 : vector<16x1xf32> to vector<16x32xf32>
    %29 = arith.subf %1, %28 : vector<16x32xf32>
    %cst_10 = arith.constant 9.99999974E-6 : f32
    %30 = vector.broadcast %cst_10 : f32 to vector<16x1xf32>
    %31 = arith.addf %27, %30 : vector<16x1xf32>
    %32 = math.rsqrt %31 : vector<16x1xf32>
    %33 = vector.broadcast %32 : vector<16x1xf32> to vector<16x32xf32>
    %34 = arith.mulf %29, %33 : vector<16x32xf32>
    %35 = vector.broadcast %11 : vector<1x32xf32> to vector<16x32xf32>
    %36 = arith.mulf %34, %35 : vector<16x32xf32>
    %37 = vector.broadcast %12 : vector<1x32xf32> to vector<16x32xf32>
    %38 = arith.addf %36, %37 : vector<16x32xf32>
    %c0_11 = arith.constant 0 : index
    %c0_12 = arith.constant 0 : index
    %c0_13 = arith.constant 0 : index
    %39 = vector.load %arg3[%c0_11, %c0_12, %c0_13] : memref<2x32x96xf32, #tpu.memory_space<vmem>>, vector<1x32x96xf32>
    %40 = vector.shape_cast %39 : vector<1x32x96xf32> to vector<32x96xf32>
    %cst_14 = arith.constant dense<0.000000e+00> : vector<16x96xf32>
    %41 = tpu.matmul %38, %40, %cst_14 {dimension_numbers = #tpu.dot_dimension_numbers<[1], [0], [0], [1], [0, 0, 1, 1], [], []>} : vector<16x32xf32>, vector<32x96xf32>, vector<16x96xf32> -> vector<16x96xf32>
    %c0_15 = arith.constant 0 : index
    %c0_16 = arith.constant 0 : index
    %c0_17 = arith.constant 0 : index
    %42 = vector.load %arg4[%c0_15, %c0_16, %c0_17] : memref<2x1x96xf32, #tpu.memory_space<vmem>>, vector<1x1x96xf32>
    %43 = vector.shape_cast %42 : vector<1x1x96xf32> to vector<1x96xf32>
    %44 = vector.broadcast %43 : vector<1x96xf32> to vector<16x96xf32>
    %45 = arith.addf %41, %44 : vector<16x96xf32>
    %46 = vector.extract_strided_slice %45 {offsets = [0, 0], sizes = [16, 32], strides = [1, 1]} : vector<16x96xf32> to vector<16x32xf32>
    %47 = vector.shape_cast %46 : vector<16x32xf32> to vector<2x8x32xf32>
    %48 = vector.extract_strided_slice %47 {offsets = [0, 0, 0], sizes = [2, 8, 8], strides = [1, 1, 1]} : vector<2x8x32xf32> to vector<2x8x8xf32>
    %49 = vector.extract_strided_slice %47 {offsets = [0, 0, 8], sizes = [2, 8, 8], strides = [1, 1, 1]} : vector<2x8x32xf32> to vector<2x8x8xf32>
    %50 = vector.extract_strided_slice %47 {offsets = [0, 0, 16], sizes = [2, 8, 8], strides = [1, 1, 1]} : vector<2x8x32xf32> to vector<2x8x8xf32>
    %51 = vector.extract_strided_slice %47 {offsets = [0, 0, 24], sizes = [2, 8, 8], strides = [1, 1, 1]} : vector<2x8x32xf32> to vector<2x8x8xf32>
    %52 = tpu.concatenate %48, %49, %50, %51 in 0 : vector<2x8x8xf32>, vector<2x8x8xf32>, vector<2x8x8xf32>, vector<2x8x8xf32> -> vector<8x8x8xf32>
    %53 = vector.extract_strided_slice %45 {offsets = [0, 32], sizes = [16, 32], strides = [1, 1]} : vector<16x96xf32> to vector<16x32xf32>
    %54 = vector.shape_cast %53 : vector<16x32xf32> to vector<2x8x32xf32>
    %55 = vector.extract_strided_slice %54 {offsets = [0, 0, 0], sizes = [2, 8, 8], strides = [1, 1, 1]} : vector<2x8x32xf32> to vector<2x8x8xf32>
    %56 = vector.extract_strided_slice %54 {offsets = [0, 0, 8], sizes = [2, 8, 8], strides = [1, 1, 1]} : vector<2x8x32xf32> to vector<2x8x8xf32>
    %57 = vector.extract_strided_slice %54 {offsets = [0, 0, 16], sizes = [2, 8, 8], strides = [1, 1, 1]} : vector<2x8x32xf32> to vector<2x8x8xf32>
    %58 = vector.extract_strided_slice %54 {offsets = [0, 0, 24], sizes = [2, 8, 8], strides = [1, 1, 1]} : vector<2x8x32xf32> to vector<2x8x8xf32>
    %59 = tpu.concatenate %55, %56, %57, %58 in 0 : vector<2x8x8xf32>, vector<2x8x8xf32>, vector<2x8x8xf32>, vector<2x8x8xf32> -> vector<8x8x8xf32>
    %60 = vector.extract_strided_slice %45 {offsets = [0, 64], sizes = [16, 32], strides = [1, 1]} : vector<16x96xf32> to vector<16x32xf32>
    %61 = vector.shape_cast %60 : vector<16x32xf32> to vector<2x8x32xf32>
    %62 = vector.extract_strided_slice %61 {offsets = [0, 0, 0], sizes = [2, 8, 8], strides = [1, 1, 1]} : vector<2x8x32xf32> to vector<2x8x8xf32>
    %63 = vector.extract_strided_slice %61 {offsets = [0, 0, 8], sizes = [2, 8, 8], strides = [1, 1, 1]} : vector<2x8x32xf32> to vector<2x8x8xf32>
    %64 = vector.extract_strided_slice %61 {offsets = [0, 0, 16], sizes = [2, 8, 8], strides = [1, 1, 1]} : vector<2x8x32xf32> to vector<2x8x8xf32>
    %65 = vector.extract_strided_slice %61 {offsets = [0, 0, 24], sizes = [2, 8, 8], strides = [1, 1, 1]} : vector<2x8x32xf32> to vector<2x8x8xf32>
    %66 = tpu.concatenate %62, %63, %64, %65 in 0 : vector<2x8x8xf32>, vector<2x8x8xf32>, vector<2x8x8xf32>, vector<2x8x8xf32> -> vector<8x8x8xf32>
    %cst_18 = arith.constant dense<0.000000e+00> : vector<8x8x8xf32>
    %67 = tpu.matmul %52, %59, %cst_18 {dimension_numbers = #tpu.dot_dimension_numbers<[2], [2], [1], [1], [0, 0, 0, 1, 1, 1], [0], [0]>} : vector<8x8x8xf32>, vector<8x8x8xf32>, vector<8x8x8xf32> -> vector<8x8x8xf32>
    %68 = vector.broadcast %8 : vector<1x8x8xf32> to vector<8x8x8xf32>
    %69 = arith.addf %67, %68 : vector<8x8x8xf32>
    %cst_19 = arith.constant dense<0xFF800000> : vector<8x8xf32>
    %70 = vector.multi_reduction <maximumf>, %69, %cst_19 [2] : vector<8x8x8xf32> to vector<8x8xf32>
    %71 = vector.shape_cast %70 : vector<8x8xf32> to vector<8x8x1xf32>
    %72 = vector.broadcast %71 : vector<8x8x1xf32> to vector<8x8x8xf32>
    %73 = arith.subf %69, %72 : vector<8x8x8xf32>
    %74 = math.exp %73 : vector<8x8x8xf32>
    %cst_20 = arith.constant dense<0.000000e+00> : vector<8x8xf32>
    %75 = vector.multi_reduction <add>, %74, %cst_20 [2] : vector<8x8x8xf32> to vector<8x8xf32>
    %76 = vector.shape_cast %75 : vector<8x8xf32> to vector<8x8x1xf32>
    %77 = vector.broadcast %76 : vector<8x8x1xf32> to vector<8x8x8xf32>
    %78 = arith.divf %74, %77 : vector<8x8x8xf32>
    %cst_21 = arith.constant dense<0.000000e+00> : vector<8x8x8xf32>
    %79 = tpu.matmul %78, %66, %cst_21 {dimension_numbers = #tpu.dot_dimension_numbers<[2], [1], [1], [2], [0, 0, 0, 1, 1, 2], [0], [0]>} : vector<8x8x8xf32>, vector<8x8x8xf32>, vector<8x8x8xf32> -> vector<8x8x8xf32>
    %80 = vector.extract_strided_slice %79 {offsets = [0, 0, 0], sizes = [2, 8, 8], strides = [1, 1, 1]} : vector<8x8x8xf32> to vector<2x8x8xf32>
    %81 = vector.extract_strided_slice %79 {offsets = [2, 0, 0], sizes = [2, 8, 8], strides = [1, 1, 1]} : vector<8x8x8xf32> to vector<2x8x8xf32>
    %82 = vector.extract_strided_slice %79 {offsets = [4, 0, 0], sizes = [2, 8, 8], strides = [1, 1, 1]} : vector<8x8x8xf32> to vector<2x8x8xf32>
    %83 = vector.extract_strided_slice %79 {offsets = [6, 0, 0], sizes = [2, 8, 8], strides = [1, 1, 1]} : vector<8x8x8xf32> to vector<2x8x8xf32>
    %84 = tpu.concatenate %80, %81, %82, %83 in 2 : vector<2x8x8xf32>, vector<2x8x8xf32>, vector<2x8x8xf32>, vector<2x8x8xf32> -> vector<2x8x32xf32>
    %85 = vector.shape_cast %84 : vector<2x8x32xf32> to vector<16x32xf32>
    %c0_22 = arith.constant 0 : index
    %c0_23 = arith.constant 0 : index
    %c0_24 = arith.constant 0 : index
    %86 = vector.load %arg5[%c0_22, %c0_23, %c0_24] : memref<2x32x32xf32, #tpu.memory_space<vmem>>, vector<1x32x32xf32>
    %87 = vector.shape_cast %86 : vector<1x32x32xf32> to vector<32x32xf32>
    %cst_25 = arith.constant dense<0.000000e+00> : vector<16x32xf32>
    %88 = tpu.matmul %85, %87, %cst_25 {dimension_numbers = #tpu.dot_dimension_numbers<[1], [0], [0], [1], [0, 0, 1, 1], [], []>} : vector<16x32xf32>, vector<32x32xf32>, vector<16x32xf32> -> vector<16x32xf32>
    %89 = vector.broadcast %15 : vector<1x32xf32> to vector<16x32xf32>
    %90 = arith.addf %88, %89 : vector<16x32xf32>
    %91 = arith.addf %1, %90 : vector<16x32xf32>
    %cst_26 = arith.constant dense<0.000000e+00> : vector<16xf32>
    %92 = vector.multi_reduction <add>, %91, %cst_26 [1] : vector<16x32xf32> to vector<16xf32>
    %93 = vector.shape_cast %92 : vector<16xf32> to vector<16x1xf32>
    %cst_27 = arith.constant 3.200000e+01 : f32
    %94 = vector.broadcast %cst_27 : f32 to vector<16x1xf32>
    %95 = arith.divf %93, %94 : vector<16x1xf32>
    %96 = vector.broadcast %95 : vector<16x1xf32> to vector<16x32xf32>
    %97 = arith.subf %91, %96 : vector<16x32xf32>
    %98 = arith.mulf %97, %97 : vector<16x32xf32>
    %cst_28 = arith.constant dense<0.000000e+00> : vector<16xf32>
    %99 = vector.multi_reduction <add>, %98, %cst_28 [1] : vector<16x32xf32> to vector<16xf32>
    %100 = vector.shape_cast %99 : vector<16xf32> to vector<16x1xf32>
    %cst_29 = arith.constant 3.200000e+01 : f32
    %101 = vector.broadcast %cst_29 : f32 to vector<16x1xf32>
    %102 = arith.divf %100, %101 : vector<16x1xf32>
    %103 = vector.broadcast %95 : vector<16x1xf32> to vector<16x32xf32>
    %104 = arith.subf %91, %103 : vector<16x32xf32>
    %cst_30 = arith.constant 9.99999974E-6 : f32
    %105 = vector.broadcast %cst_30 : f32 to vector<16x1xf32>
    %106 = arith.addf %102, %105 : vector<16x1xf32>
    %107 = math.rsqrt %106 : vector<16x1xf32>
    %108 = vector.broadcast %107 : vector<16x1xf32> to vector<16x32xf32>
    %109 = arith.mulf %104, %108 : vector<16x32xf32>
    %110 = vector.broadcast %13 : vector<1x32xf32> to vector<16x32xf32>
    %111 = arith.mulf %109, %110 : vector<16x32xf32>
    %112 = vector.broadcast %14 : vector<1x32xf32> to vector<16x32xf32>
    %113 = arith.addf %111, %112 : vector<16x32xf32>
    %c0_31 = arith.constant 0 : index
    %c0_32 = arith.constant 0 : index
    %c0_33 = arith.constant 0 : index
    %114 = vector.load %arg6[%c0_31, %c0_32, %c0_33] : memref<2x32x128xf32, #tpu.memory_space<vmem>>, vector<1x32x128xf32>
    %115 = vector.shape_cast %114 : vector<1x32x128xf32> to vector<32x128xf32>
    %cst_34 = arith.constant dense<0.000000e+00> : vector<16x128xf32>
    %116 = tpu.matmul %113, %115, %cst_34 {dimension_numbers = #tpu.dot_dimension_numbers<[1], [0], [0], [1], [0, 0, 1, 1], [], []>} : vector<16x32xf32>, vector<32x128xf32>, vector<16x128xf32> -> vector<16x128xf32>
    %c0_35 = arith.constant 0 : index
    %c0_36 = arith.constant 0 : index
    %c0_37 = arith.constant 0 : index
    %117 = vector.load %arg7[%c0_35, %c0_36, %c0_37] : memref<2x1x128xf32, #tpu.memory_space<vmem>>, vector<1x1x128xf32>
    %118 = vector.shape_cast %117 : vector<1x1x128xf32> to vector<1x128xf32>
    %119 = vector.broadcast %118 : vector<1x128xf32> to vector<16x128xf32>
    %120 = arith.addf %116, %119 : vector<16x128xf32>
    %cst_38 = arith.constant 5.000000e-01 : f32
    %121 = vector.broadcast %cst_38 : f32 to vector<16x128xf32>
    %122 = arith.mulf %121, %120 : vector<16x128xf32>
    %cst_39 = arith.constant 4.471500e-02 : f32
    %123 = vector.broadcast %cst_39 : f32 to vector<16x128xf32>
    %124 = arith.mulf %123, %120 : vector<16x128xf32>
    %125 = arith.mulf %124, %120 : vector<16x128xf32>
    %126 = arith.mulf %125, %120 : vector<16x128xf32>
    %127 = arith.addf %120, %126 : vector<16x128xf32>
    %cst_40 = arith.constant 0.797884583 : f32
    %128 = vector.broadcast %cst_40 : f32 to vector<16x128xf32>
    %129 = arith.mulf %128, %127 : vector<16x128xf32>
    %130 = math.tanh %129 : vector<16x128xf32>
    %cst_41 = arith.constant 1.000000e+00 : f32
    %131 = vector.broadcast %cst_41 : f32 to vector<16x128xf32>
    %132 = arith.addf %131, %130 : vector<16x128xf32>
    %133 = arith.mulf %122, %132 : vector<16x128xf32>
    %c0_42 = arith.constant 0 : index
    %c0_43 = arith.constant 0 : index
    %c0_44 = arith.constant 0 : index
    %134 = vector.load %arg8[%c0_42, %c0_43, %c0_44] : memref<2x128x32xf32, #tpu.memory_space<vmem>>, vector<1x128x32xf32>
    %135 = vector.shape_cast %134 : vector<1x128x32xf32> to vector<128x32xf32>
    %cst_45 = arith.constant dense<0.000000e+00> : vector<16x32xf32>
    %136 = tpu.matmul %133, %135, %cst_45 {dimension_numbers = #tpu.dot_dimension_numbers<[1], [0], [0], [1], [0, 0, 1, 1], [], []>} : vector<16x128xf32>, vector<128x32xf32>, vector<16x32xf32> -> vector<16x32xf32>
    %137 = vector.broadcast %16 : vector<1x32xf32> to vector<16x32xf32>
    %138 = arith.addf %136, %137 : vector<16x32xf32>
    %139 = arith.addf %91, %138 : vector<16x32xf32>
    %c1 = arith.constant 1 : index
    %c0_46 = arith.constant 0 : index
    %c0_47 = arith.constant 0 : index
    %140 = vector.load %arg2[%c1, %c0_46, %c0_47] : memref<2x6x32xf32, #tpu.memory_space<vmem>>, vector<1x6x32xf32>
    %141 = vector.shape_cast %140 : vector<1x6x32xf32> to vector<6x32xf32>
    %142 = vector.extract_strided_slice %141 {offsets = [0, 0], sizes = [1, 32], strides = [1, 1]} : vector<6x32xf32> to vector<1x32xf32>
    %143 = vector.extract_strided_slice %141 {offsets = [1, 0], sizes = [1, 32], strides = [1, 1]} : vector<6x32xf32> to vector<1x32xf32>
    %144 = vector.extract_strided_slice %141 {offsets = [2, 0], sizes = [1, 32], strides = [1, 1]} : vector<6x32xf32> to vector<1x32xf32>
    %145 = vector.extract_strided_slice %141 {offsets = [3, 0], sizes = [1, 32], strides = [1, 1]} : vector<6x32xf32> to vector<1x32xf32>
    %146 = vector.extract_strided_slice %141 {offsets = [4, 0], sizes = [1, 32], strides = [1, 1]} : vector<6x32xf32> to vector<1x32xf32>
    %147 = vector.extract_strided_slice %141 {offsets = [5, 0], sizes = [1, 32], strides = [1, 1]} : vector<6x32xf32> to vector<1x32xf32>
    %cst_48 = arith.constant dense<0.000000e+00> : vector<16xf32>
    %148 = vector.multi_reduction <add>, %139, %cst_48 [1] : vector<16x32xf32> to vector<16xf32>
    %149 = vector.shape_cast %148 : vector<16xf32> to vector<16x1xf32>
    %cst_49 = arith.constant 3.200000e+01 : f32
    %150 = vector.broadcast %cst_49 : f32 to vector<16x1xf32>
    %151 = arith.divf %149, %150 : vector<16x1xf32>
    %152 = vector.broadcast %151 : vector<16x1xf32> to vector<16x32xf32>
    %153 = arith.subf %139, %152 : vector<16x32xf32>
    %154 = arith.mulf %153, %153 : vector<16x32xf32>
    %cst_50 = arith.constant dense<0.000000e+00> : vector<16xf32>
    %155 = vector.multi_reduction <add>, %154, %cst_50 [1] : vector<16x32xf32> to vector<16xf32>
    %156 = vector.shape_cast %155 : vector<16xf32> to vector<16x1xf32>
    %cst_51 = arith.constant 3.200000e+01 : f32
    %157 = vector.broadcast %cst_51 : f32 to vector<16x1xf32>
    %158 = arith.divf %156, %157 : vector<16x1xf32>
    %159 = vector.broadcast %151 : vector<16x1xf32> to vector<16x32xf32>
    %160 = arith.subf %139, %159 : vector<16x32xf32>
    %cst_52 = arith.constant 9.99999974E-6 : f32
    %161 = vector.broadcast %cst_52 : f32 to vector<16x1xf32>
    %162 = arith.addf %158, %161 : vector<16x1xf32>
    %163 = math.rsqrt %162 : vector<16x1xf32>
    %164 = vector.broadcast %163 : vector<16x1xf32> to vector<16x32xf32>
    %165 = arith.mulf %160, %164 : vector<16x32xf32>
    %166 = vector.broadcast %142 : vector<1x32xf32> to vector<16x32xf32>
    %167 = arith.mulf %165, %166 : vector<16x32xf32>
    %168 = vector.broadcast %143 : vector<1x32xf32> to vector<16x32xf32>
    %169 = arith.addf %167, %168 : vector<16x32xf32>
    %c1_53 = arith.constant 1 : index
    %c0_54 = arith.constant 0 : index
    %c0_55 = arith.constant 0 : index
    %170 = vector.load %arg3[%c1_53, %c0_54, %c0_55] : memref<2x32x96xf32, #tpu.memory_space<vmem>>, vector<1x32x96xf32>
    %171 = vector.shape_cast %170 : vector<1x32x96xf32> to vector<32x96xf32>
    %cst_56 = arith.constant dense<0.000000e+00> : vector<16x96xf32>
    %172 = tpu.matmul %169, %171, %cst_56 {dimension_numbers = #tpu.dot_dimension_numbers<[1], [0], [0], [1], [0, 0, 1, 1], [], []>} : vector<16x32xf32>, vector<32x96xf32>, vector<16x96xf32> -> vector<16x96xf32>
    %c1_57 = arith.constant 1 : index
    %c0_58 = arith.constant 0 : index
    %c0_59 = arith.constant 0 : index
    %173 = vector.load %arg4[%c1_57, %c0_58, %c0_59] : memref<2x1x96xf32, #tpu.memory_space<vmem>>, vector<1x1x96xf32>
    %174 = vector.shape_cast %173 : vector<1x1x96xf32> to vector<1x96xf32>
    %175 = vector.broadcast %174 : vector<1x96xf32> to vector<16x96xf32>
    %176 = arith.addf %172, %175 : vector<16x96xf32>
    %177 = vector.extract_strided_slice %176 {offsets = [0, 0], sizes = [16, 32], strides = [1, 1]} : vector<16x96xf32> to vector<16x32xf32>
    %178 = vector.shape_cast %177 : vector<16x32xf32> to vector<2x8x32xf32>
    %179 = vector.extract_strided_slice %178 {offsets = [0, 0, 0], sizes = [2, 8, 8], strides = [1, 1, 1]} : vector<2x8x32xf32> to vector<2x8x8xf32>
    %180 = vector.extract_strided_slice %178 {offsets = [0, 0, 8], sizes = [2, 8, 8], strides = [1, 1, 1]} : vector<2x8x32xf32> to vector<2x8x8xf32>
    %181 = vector.extract_strided_slice %178 {offsets = [0, 0, 16], sizes = [2, 8, 8], strides = [1, 1, 1]} : vector<2x8x32xf32> to vector<2x8x8xf32>
    %182 = vector.extract_strided_slice %178 {offsets = [0, 0, 24], sizes = [2, 8, 8], strides = [1, 1, 1]} : vector<2x8x32xf32> to vector<2x8x8xf32>
    %183 = tpu.concatenate %179, %180, %181, %182 in 0 : vector<2x8x8xf32>, vector<2x8x8xf32>, vector<2x8x8xf32>, vector<2x8x8xf32> -> vector<8x8x8xf32>
    %184 = vector.extract_strided_slice %176 {offsets = [0, 32], sizes = [16, 32], strides = [1, 1]} : vector<16x96xf32> to vector<16x32xf32>
    %185 = vector.shape_cast %184 : vector<16x32xf32> to vector<2x8x32xf32>
    %186 = vector.extract_strided_slice %185 {offsets = [0, 0, 0], sizes = [2, 8, 8], strides = [1, 1, 1]} : vector<2x8x32xf32> to vector<2x8x8xf32>
    %187 = vector.extract_strided_slice %185 {offsets = [0, 0, 8], sizes = [2, 8, 8], strides = [1, 1, 1]} : vector<2x8x32xf32> to vector<2x8x8xf32>
    %188 = vector.extract_strided_slice %185 {offsets = [0, 0, 16], sizes = [2, 8, 8], strides = [1, 1, 1]} : vector<2x8x32xf32> to vector<2x8x8xf32>
    %189 = vector.extract_strided_slice %185 {offsets = [0, 0, 24], sizes = [2, 8, 8], strides = [1, 1, 1]} : vector<2x8x32xf32> to vector<2x8x8xf32>
    %190 = tpu.concatenate %186, %187, %188, %189 in 0 : vector<2x8x8xf32>, vector<2x8x8xf32>, vector<2x8x8xf32>, vector<2x8x8xf32> -> vector<8x8x8xf32>
    %191 = vector.extract_strided_slice %176 {offsets = [0, 64], sizes = [16, 32], strides = [1, 1]} : vector<16x96xf32> to vector<16x32xf32>
    %192 = vector.shape_cast %191 : vector<16x32xf32> to vector<2x8x32xf32>
    %193 = vector.extract_strided_slice %192 {offsets = [0, 0, 0], sizes = [2, 8, 8], strides = [1, 1, 1]} : vector<2x8x32xf32> to vector<2x8x8xf32>
    %194 = vector.extract_strided_slice %192 {offsets = [0, 0, 8], sizes = [2, 8, 8], strides = [1, 1, 1]} : vector<2x8x32xf32> to vector<2x8x8xf32>
    %195 = vector.extract_strided_slice %192 {offsets = [0, 0, 16], sizes = [2, 8, 8], strides = [1, 1, 1]} : vector<2x8x32xf32> to vector<2x8x8xf32>
    %196 = vector.extract_strided_slice %192 {offsets = [0, 0, 24], sizes = [2, 8, 8], strides = [1, 1, 1]} : vector<2x8x32xf32> to vector<2x8x8xf32>
    %197 = tpu.concatenate %193, %194, %195, %196 in 0 : vector<2x8x8xf32>, vector<2x8x8xf32>, vector<2x8x8xf32>, vector<2x8x8xf32> -> vector<8x8x8xf32>
    %cst_60 = arith.constant dense<0.000000e+00> : vector<8x8x8xf32>
    %198 = tpu.matmul %183, %190, %cst_60 {dimension_numbers = #tpu.dot_dimension_numbers<[2], [2], [1], [1], [0, 0, 0, 1, 1, 1], [0], [0]>} : vector<8x8x8xf32>, vector<8x8x8xf32>, vector<8x8x8xf32> -> vector<8x8x8xf32>
    %199 = vector.broadcast %8 : vector<1x8x8xf32> to vector<8x8x8xf32>
    %200 = arith.addf %198, %199 : vector<8x8x8xf32>
    %cst_61 = arith.constant dense<0xFF800000> : vector<8x8xf32>
    %201 = vector.multi_reduction <maximumf>, %200, %cst_61 [2] : vector<8x8x8xf32> to vector<8x8xf32>
    %202 = vector.shape_cast %201 : vector<8x8xf32> to vector<8x8x1xf32>
    %203 = vector.broadcast %202 : vector<8x8x1xf32> to vector<8x8x8xf32>
    %204 = arith.subf %200, %203 : vector<8x8x8xf32>
    %205 = math.exp %204 : vector<8x8x8xf32>
    %cst_62 = arith.constant dense<0.000000e+00> : vector<8x8xf32>
    %206 = vector.multi_reduction <add>, %205, %cst_62 [2] : vector<8x8x8xf32> to vector<8x8xf32>
    %207 = vector.shape_cast %206 : vector<8x8xf32> to vector<8x8x1xf32>
    %208 = vector.broadcast %207 : vector<8x8x1xf32> to vector<8x8x8xf32>
    %209 = arith.divf %205, %208 : vector<8x8x8xf32>
    %cst_63 = arith.constant dense<0.000000e+00> : vector<8x8x8xf32>
    %210 = tpu.matmul %209, %197, %cst_63 {dimension_numbers = #tpu.dot_dimension_numbers<[2], [1], [1], [2], [0, 0, 0, 1, 1, 2], [0], [0]>} : vector<8x8x8xf32>, vector<8x8x8xf32>, vector<8x8x8xf32> -> vector<8x8x8xf32>
    %211 = vector.extract_strided_slice %210 {offsets = [0, 0, 0], sizes = [2, 8, 8], strides = [1, 1, 1]} : vector<8x8x8xf32> to vector<2x8x8xf32>
    %212 = vector.extract_strided_slice %210 {offsets = [2, 0, 0], sizes = [2, 8, 8], strides = [1, 1, 1]} : vector<8x8x8xf32> to vector<2x8x8xf32>
    %213 = vector.extract_strided_slice %210 {offsets = [4, 0, 0], sizes = [2, 8, 8], strides = [1, 1, 1]} : vector<8x8x8xf32> to vector<2x8x8xf32>
    %214 = vector.extract_strided_slice %210 {offsets = [6, 0, 0], sizes = [2, 8, 8], strides = [1, 1, 1]} : vector<8x8x8xf32> to vector<2x8x8xf32>
    %215 = tpu.concatenate %211, %212, %213, %214 in 2 : vector<2x8x8xf32>, vector<2x8x8xf32>, vector<2x8x8xf32>, vector<2x8x8xf32> -> vector<2x8x32xf32>
    %216 = vector.shape_cast %215 : vector<2x8x32xf32> to vector<16x32xf32>
    %c1_64 = arith.constant 1 : index
    %c0_65 = arith.constant 0 : index
    %c0_66 = arith.constant 0 : index
    %217 = vector.load %arg5[%c1_64, %c0_65, %c0_66] : memref<2x32x32xf32, #tpu.memory_space<vmem>>, vector<1x32x32xf32>
    %218 = vector.shape_cast %217 : vector<1x32x32xf32> to vector<32x32xf32>
    %cst_67 = arith.constant dense<0.000000e+00> : vector<16x32xf32>
    %219 = tpu.matmul %216, %218, %cst_67 {dimension_numbers = #tpu.dot_dimension_numbers<[1], [0], [0], [1], [0, 0, 1, 1], [], []>} : vector<16x32xf32>, vector<32x32xf32>, vector<16x32xf32> -> vector<16x32xf32>
    %220 = vector.broadcast %146 : vector<1x32xf32> to vector<16x32xf32>
    %221 = arith.addf %219, %220 : vector<16x32xf32>
    %222 = arith.addf %139, %221 : vector<16x32xf32>
    %cst_68 = arith.constant dense<0.000000e+00> : vector<16xf32>
    %223 = vector.multi_reduction <add>, %222, %cst_68 [1] : vector<16x32xf32> to vector<16xf32>
    %224 = vector.shape_cast %223 : vector<16xf32> to vector<16x1xf32>
    %cst_69 = arith.constant 3.200000e+01 : f32
    %225 = vector.broadcast %cst_69 : f32 to vector<16x1xf32>
    %226 = arith.divf %224, %225 : vector<16x1xf32>
    %227 = vector.broadcast %226 : vector<16x1xf32> to vector<16x32xf32>
    %228 = arith.subf %222, %227 : vector<16x32xf32>
    %229 = arith.mulf %228, %228 : vector<16x32xf32>
    %cst_70 = arith.constant dense<0.000000e+00> : vector<16xf32>
    %230 = vector.multi_reduction <add>, %229, %cst_70 [1] : vector<16x32xf32> to vector<16xf32>
    %231 = vector.shape_cast %230 : vector<16xf32> to vector<16x1xf32>
    %cst_71 = arith.constant 3.200000e+01 : f32
    %232 = vector.broadcast %cst_71 : f32 to vector<16x1xf32>
    %233 = arith.divf %231, %232 : vector<16x1xf32>
    %234 = vector.broadcast %226 : vector<16x1xf32> to vector<16x32xf32>
    %235 = arith.subf %222, %234 : vector<16x32xf32>
    %cst_72 = arith.constant 9.99999974E-6 : f32
    %236 = vector.broadcast %cst_72 : f32 to vector<16x1xf32>
    %237 = arith.addf %233, %236 : vector<16x1xf32>
    %238 = math.rsqrt %237 : vector<16x1xf32>
    %239 = vector.broadcast %238 : vector<16x1xf32> to vector<16x32xf32>
    %240 = arith.mulf %235, %239 : vector<16x32xf32>
    %241 = vector.broadcast %144 : vector<1x32xf32> to vector<16x32xf32>
    %242 = arith.mulf %240, %241 : vector<16x32xf32>
    %243 = vector.broadcast %145 : vector<1x32xf32> to vector<16x32xf32>
    %244 = arith.addf %242, %243 : vector<16x32xf32>
    %c1_73 = arith.constant 1 : index
    %c0_74 = arith.constant 0 : index
    %c0_75 = arith.constant 0 : index
    %245 = vector.load %arg6[%c1_73, %c0_74, %c0_75] : memref<2x32x128xf32, #tpu.memory_space<vmem>>, vector<1x32x128xf32>
    %246 = vector.shape_cast %245 : vector<1x32x128xf32> to vector<32x128xf32>
    %cst_76 = arith.constant dense<0.000000e+00> : vector<16x128xf32>
    %247 = tpu.matmul %244, %246, %cst_76 {dimension_numbers = #tpu.dot_dimension_numbers<[1], [0], [0], [1], [0, 0, 1, 1], [], []>} : vector<16x32xf32>, vector<32x128xf32>, vector<16x128xf32> -> vector<16x128xf32>
    %c1_77 = arith.constant 1 : index
    %c0_78 = arith.constant 0 : index
    %c0_79 = arith.constant 0 : index
    %248 = vector.load %arg7[%c1_77, %c0_78, %c0_79] : memref<2x1x128xf32, #tpu.memory_space<vmem>>, vector<1x1x128xf32>
    %249 = vector.shape_cast %248 : vector<1x1x128xf32> to vector<1x128xf32>
    %250 = vector.broadcast %249 : vector<1x128xf32> to vector<16x128xf32>
    %251 = arith.addf %247, %250 : vector<16x128xf32>
    %cst_80 = arith.constant 5.000000e-01 : f32
    %252 = vector.broadcast %cst_80 : f32 to vector<16x128xf32>
    %253 = arith.mulf %252, %251 : vector<16x128xf32>
    %cst_81 = arith.constant 4.471500e-02 : f32
    %254 = vector.broadcast %cst_81 : f32 to vector<16x128xf32>
    %255 = arith.mulf %254, %251 : vector<16x128xf32>
    %256 = arith.mulf %255, %251 : vector<16x128xf32>
    %257 = arith.mulf %256, %251 : vector<16x128xf32>
    %258 = arith.addf %251, %257 : vector<16x128xf32>
    %cst_82 = arith.constant 0.797884583 : f32
    %259 = vector.broadcast %cst_82 : f32 to vector<16x128xf32>
    %260 = arith.mulf %259, %258 : vector<16x128xf32>
    %261 = math.tanh %260 : vector<16x128xf32>
    %cst_83 = arith.constant 1.000000e+00 : f32
    %262 = vector.broadcast %cst_83 : f32 to vector<16x128xf32>
    %263 = arith.addf %262, %261 : vector<16x128xf32>
    %264 = arith.mulf %253, %263 : vector<16x128xf32>
    %c1_84 = arith.constant 1 : index
    %c0_85 = arith.constant 0 : index
    %c0_86 = arith.constant 0 : index
    %265 = vector.load %arg8[%c1_84, %c0_85, %c0_86] : memref<2x128x32xf32, #tpu.memory_space<vmem>>, vector<1x128x32xf32>
    %266 = vector.shape_cast %265 : vector<1x128x32xf32> to vector<128x32xf32>
    %cst_87 = arith.constant dense<0.000000e+00> : vector<16x32xf32>
    %267 = tpu.matmul %264, %266, %cst_87 {dimension_numbers = #tpu.dot_dimension_numbers<[1], [0], [0], [1], [0, 0, 1, 1], [], []>} : vector<16x128xf32>, vector<128x32xf32>, vector<16x32xf32> -> vector<16x32xf32>
    %268 = vector.broadcast %147 : vector<1x32xf32> to vector<16x32xf32>
    %269 = arith.addf %267, %268 : vector<16x32xf32>
    %270 = arith.addf %222, %269 : vector<16x32xf32>
    %c0_88 = arith.constant 0 : index
    %c0_89 = arith.constant 0 : index
    %271 = vector.load %arg9[%c0_88, %c0_89] : memref<2x32xf32, #tpu.memory_space<vmem>>, vector<2x32xf32>
    %272 = vector.extract_strided_slice %271 {offsets = [0, 0], sizes = [1, 32], strides = [1, 1]} : vector<2x32xf32> to vector<1x32xf32>
    %273 = vector.extract_strided_slice %271 {offsets = [1, 0], sizes = [1, 32], strides = [1, 1]} : vector<2x32xf32> to vector<1x32xf32>
    %cst_90 = arith.constant dense<0.000000e+00> : vector<16xf32>
    %274 = vector.multi_reduction <add>, %270, %cst_90 [1] : vector<16x32xf32> to vector<16xf32>
    %275 = vector.shape_cast %274 : vector<16xf32> to vector<16x1xf32>
    %cst_91 = arith.constant 3.200000e+01 : f32
    %276 = vector.broadcast %cst_91 : f32 to vector<16x1xf32>
    %277 = arith.divf %275, %276 : vector<16x1xf32>
    %278 = vector.broadcast %277 : vector<16x1xf32> to vector<16x32xf32>
    %279 = arith.subf %270, %278 : vector<16x32xf32>
    %280 = arith.mulf %279, %279 : vector<16x32xf32>
    %cst_92 = arith.constant dense<0.000000e+00> : vector<16xf32>
    %281 = vector.multi_reduction <add>, %280, %cst_92 [1] : vector<16x32xf32> to vector<16xf32>
    %282 = vector.shape_cast %281 : vector<16xf32> to vector<16x1xf32>
    %cst_93 = arith.constant 3.200000e+01 : f32
    %283 = vector.broadcast %cst_93 : f32 to vector<16x1xf32>
    %284 = arith.divf %282, %283 : vector<16x1xf32>
    %285 = vector.broadcast %277 : vector<16x1xf32> to vector<16x32xf32>
    %286 = arith.subf %270, %285 : vector<16x32xf32>
    %cst_94 = arith.constant 9.99999974E-6 : f32
    %287 = vector.broadcast %cst_94 : f32 to vector<16x1xf32>
    %288 = arith.addf %284, %287 : vector<16x1xf32>
    %289 = math.rsqrt %288 : vector<16x1xf32>
    %290 = vector.broadcast %289 : vector<16x1xf32> to vector<16x32xf32>
    %291 = arith.mulf %286, %290 : vector<16x32xf32>
    %292 = vector.broadcast %272 : vector<1x32xf32> to vector<16x32xf32>
    %293 = arith.mulf %291, %292 : vector<16x32xf32>
    %294 = vector.broadcast %273 : vector<1x32xf32> to vector<16x32xf32>
    %295 = arith.addf %293, %294 : vector<16x32xf32>
    %c0_95 = arith.constant 0 : index
    %c0_96 = arith.constant 0 : index
    %296 = vector.load %arg10[%c0_95, %c0_96] : memref<32x128xf32, #tpu.memory_space<vmem>>, vector<32x128xf32>
    %cst_97 = arith.constant dense<0.000000e+00> : vector<16x128xf32>
    %297 = tpu.matmul %295, %296, %cst_97 {dimension_numbers = #tpu.dot_dimension_numbers<[1], [0], [0], [1], [0, 0, 1, 1], [], []>} : vector<16x32xf32>, vector<32x128xf32>, vector<16x128xf32> -> vector<16x128xf32>
    %298 = vector.shape_cast %297 : vector<16x128xf32> to vector<2x8x128xf32>
    %c0_98 = arith.constant 0 : index
    %c0_99 = arith.constant 0 : index
    %c0_100 = arith.constant 0 : index
    %299 = vector.load %arg11[%c0_98, %c0_99, %c0_100] : memref<2x8x128xf32, #tpu.memory_space<vmem>>, vector<2x8x128xf32>
    tpu.vector_store %arg11[%c0_98, %c0_99, %c0_100], %298 {strides = array<i32>} : memref<2x8x128xf32, #tpu.memory_space<vmem>>, vector<2x8x128xf32>,
    return
  }
  func.func @transform_0(%arg0: i32) -> (i32, i32, i32) {
    %c0_i32 = arith.constant 0 : i32
    %c0_i32_0 = arith.constant 0 : i32
    %c0_i32_1 = arith.constant 0 : i32
    return %arg0, %c0_i32, %c0_i32_0 : i32, i32, i32
  }
  func.func @transform_1(%arg0: i32) -> (i32, i32, i32) {
    %c0_i32 = arith.constant 0 : i32
    %c0_i32_0 = arith.constant 0 : i32
    %c0_i32_1 = arith.constant 0 : i32
    %c0_i32_2 = arith.constant 0 : i32
    return %c0_i32, %c0_i32_0, %c0_i32_1 : i32, i32, i32
  }
  func.func @transform_2(%arg0: i32) -> (i32, i32, i32) {
    %c0_i32 = arith.constant 0 : i32
    %c0_i32_0 = arith.constant 0 : i32
    %c0_i32_1 = arith.constant 0 : i32
    %c0_i32_2 = arith.constant 0 : i32
    return %c0_i32, %c0_i32_0, %c0_i32_1 : i32, i32, i32
  }
  func.func @transform_3(%arg0: i32) -> (i32, i32, i32) {
    %c0_i32 = arith.constant 0 : i32
    %c0_i32_0 = arith.constant 0 : i32
    %c0_i32_1 = arith.constant 0 : i32
    %c0_i32_2 = arith.constant 0 : i32
    return %c0_i32, %c0_i32_0, %c0_i32_1 : i32, i32, i32
  }
  func.func @transform_4(%arg0: i32) -> (i32, i32, i32) {
    %c0_i32 = arith.constant 0 : i32
    %c0_i32_0 = arith.constant 0 : i32
    %c0_i32_1 = arith.constant 0 : i32
    %c0_i32_2 = arith.constant 0 : i32
    return %c0_i32, %c0_i32_0, %c0_i32_1 : i32, i32, i32
  }
  func.func @transform_5(%arg0: i32) -> (i32, i32, i32) {
    %c0_i32 = arith.constant 0 : i32
    %c0_i32_0 = arith.constant 0 : i32
    %c0_i32_1 = arith.constant 0 : i32
    %c0_i32_2 = arith.constant 0 : i32
    return %c0_i32, %c0_i32_0, %c0_i32_1 : i32, i32, i32
  }
  func.func @transform_6(%arg0: i32) -> (i32, i32, i32) {
    %c0_i32 = arith.constant 0 : i32
    %c0_i32_0 = arith.constant 0 : i32
    %c0_i32_1 = arith.constant 0 : i32
    %c0_i32_2 = arith.constant 0 : i32
    return %c0_i32, %c0_i32_0, %c0_i32_1 : i32, i32, i32
  }
  func.func @transform_7(%arg0: i32) -> (i32, i32, i32) {
    %c0_i32 = arith.constant 0 : i32
    %c0_i32_0 = arith.constant 0 : i32
    %c0_i32_1 = arith.constant 0 : i32
    %c0_i32_2 = arith.constant 0 : i32
    return %c0_i32, %c0_i32_0, %c0_i32_1 : i32, i32, i32
  }
  func.func @transform_8(%arg0: i32) -> (i32, i32) {
    %c0_i32 = arith.constant 0 : i32
    %c0_i32_0 = arith.constant 0 : i32
    %c0_i32_1 = arith.constant 0 : i32
    return %c0_i32, %c0_i32_0 : i32, i32
  }
  func.func @transform_9(%arg0: i32) -> (i32, i32) {
    %c0_i32 = arith.constant 0 : i32
    %c0_i32_0 = arith.constant 0 : i32
    %c0_i32_1 = arith.constant 0 : i32
    return %c0_i32, %c0_i32_0 : i32, i32
  }
  func.func @transform_10(%arg0: i32) -> (i32, i32, i32) {
    %c0_i32 = arith.constant 0 : i32
    %c0_i32_0 = arith.constant 0 : i32
    %c0_i32_1 = arith.constant 0 : i32
    return %arg0, %c0_i32, %c0_i32_0 : i32, i32, i32
  }
}

</mosaic_0001>

<bundles_post_ra>
// kernel: tpu_custom_call.1
= control target key start
LH: loop header
LB: loop body
LE: loop exit
PB: predicated region body
PF: predicated region fallthrough
CT: control target
= control target key end

     0   :  { %vm45_vm0 = vcmask 261120   ;;  %s5420_s0 = inlined_call_operand.vmem [shape: f32[2,8,32], index: 0, kind: input, shape index: {}]   ;;  %s5421_s1 = inlined_call_operand.vmem [shape: f32[2,6,32], index: 1, kind: input, shape index: {}]   ;;  %s5422_s2 = inlined_call_operand.vmem [shape: f32[2,32,96], index: 2, kind: input, shape index: {}]   ;;  %s5423_s3 = inlined_call_operand.vmem [shape: f32[2,1,96], index: 3, kind: input, shape index: {}]   ;;  %s5424_s4 = inlined_call_operand.vmem [shape: f32[2,32,32], index: 4, kind: input, shape index: {}]   ;;  %s5425_s5 = inlined_call_operand.vmem [shape: f32[2,32,128], index: 5, kind: input, shape index: {}]   ;;  %s5426_s6 = inlined_call_operand.vmem [shape: f32[2,1,128], index: 6, kind: input, shape index: {}]   ;;  %s5427_s7 = inlined_call_operand.vmem [shape: f32[2,128,32], index: 7, kind: input, shape index: {}]   ;;  %s5428_s8 = inlined_call_operand.vmem [shape: f32[2,32], index: 8, kind: input, shape index: {}]   ;;  %s5429_s9 = inlined_call_operand.vmem [shape: f32[32,128], index: 9, kind: input, shape index: {}]   ;;  %s5430_s10 = inlined_call_operand.hbm [shape: f32[2,8,128], index: 10, kind: output, shape index: {}]  }
   0x1   :  { %v4694_v0 = vld [vmem:[%s5420_s0] sm:$0xff]  ;;  %v4699_v1 = vld [vmem:[%s5420_s0 + $0x8] sm:$0xff] }
   0x2   :  { %15 = vsyncpa [#allocation3], 0  ;;  %v46_v2 = vsel %vm45_vm0, %v4694_v0, 0.0  ;;  %v49_v3 = vsel %vm45_vm0, %v4699_v1, 0.0  ;;  %v85_v14 = vld [vmem:[%s5422_s2] sm:$0xff]  ;;  %v86_v15 = vld [vmem:[%s5422_s2 + $0x8] sm:$0xff]  ;;  %v38_v22 = vlaneseq }
   0x3   :  { %47 = vadd.xlane.f32.xlu0 %v46_v2  ;;  %v87_v16 = vld [vmem:[%s5422_s2 + $0x10] sm:$0xff]  ;;  %v4374_v17 = vpack.c.bf16 %v86_v15, %v85_v14  ;;  %v88_v18 = vld [vmem:[%s5422_s2 + $0x18] sm:$0xff]  ;;  %v4730_v29 = vld [vmem:[%s5421_s1] sm:$0x3f]  ;;  %v4623_v42 = vmov 0.0   ;;  %vm4624_vm1 = vmmov 0  }
   0x4   :  { %v4378_v19 = vpack.c.bf16 %v88_v18, %v87_v16  ;;  %v4722_v26 = vshrl.u32 %v38_v22, 7  ;;  %v3828_v41 = vld [vmem:[%s5423_s3] ss:$0 sm:$0xff]  ;;  %4098 = vmatprep.subr.mxu0 %v4623_v42  ;;  %4100 = vmatprep.mubr.msk.f32.mxu0 %vm4624_vm1, %v4623_v42  ;;  %s4625_s28 = smov 120   ;;  %s4626_s29 = smov 112   ;;  %vm193_vm2 = vcmask 64512  }
   0x5   :  { %4375 = vmatprep.subr.bf16.mxu1 %v4374_v17  ;;  %s4627_s30 = smov 104   ;;  %s4628_s11 = smov 96   ;;  %v41_v61 = vand.u32 127, %v38_v22  ;;  %v4629_v62 = vmov -1e+09   ;;  %vm1522_vm4 = vcmask 130048  }
   0x6   :  { %4377 = vmatpush3.bf16.msra.mxu1 %v4374_v17  ;;  %v4725_v28 = vsub.s32 0, %v4722_v26  ;;  %v4733_v30 = vsub.s32 1, %v4722_v26  ;;  %s4630_s12 = smov 64   ;;  %s4631_s20 = smov 8   ;;  %vm1525_vm5 = vcmask 195584  }
   0x7   :  { %50 = vadd.xlane.f32.xlu0 %v49_v3  ;;  %4379 = vmatprep.subr.bf16.mxu1 %v4378_v19  ;;  %vm42_vm3 = vcmp.le.s32.totalorder %v41_v61, %v4722_v26  ;;  %s4632_s21 = smov 16   ;;  %s4633_s22 = smov 24  }
   0x8   :  { %v76_v31 = vrot.slane %v4730_v29, %v4725_v28  ;;  %v82_v34 = vrot.slane %v4730_v29, %v4733_v30  ;;  %v4844_v63 = vsel %vm42_vm3, 0.0, %v4629_v62 }
   0xa   :  { %4381 = vmatpush3.bf16.msra.mxu1 %v4378_v19 }
   0xb   :  { %4078 = vmatprep.subr.mxu1 %v4623_v42 }
  0x90   :  { %v48_v4 = vpop.xlane.xlu0 %47 }
  0x91   :  { %v53_v5 = vmul.f32 0.03125, %v48_v4 }
  0x93   :  { %v55_v6 = vsub.f32 %v4694_v0, %v53_v5 }
  0x94   :  { %v51_v7 = vpop.xlane.xlu0 %50 }
  0x95   :  { %v54_v8 = vmul.f32 0.03125, %v51_v7  ;;  %v57_v9 = vmul.f32 %v55_v6, %v55_v6 }
  0x97   :  { %v56_v10 = vsub.f32 %v4699_v1, %v54_v8  ;;  %v59_v11 = vsel %vm45_vm0, %v57_v9, 0.0 }
  0x98   :  { %60 = vadd.xlane.f32.xlu1 %v59_v11 }
  0x99   :  { %v58_v12 = vmul.f32 %v56_v10, %v56_v10 }
  0x9b   :  { %v62_v13 = vsel %vm45_vm0, %v58_v12, 0.0 }
  0x9c   :  { %63 = vadd.xlane.f32.xlu1 %v62_v13 }
 0x125   :  { %v61_v20 = vpop.xlane.xlu1 %60 }
 0x126   :  { %v65_v21 = vmul.f32 0.03125, %v61_v20 }
 0x128   :  { %v67_v23 = vadd.f32 1e-05, %v65_v21 }
 0x129   :  { %v64_v24 = vpop.xlane.xlu1 %63 }
 0x12a   :  { %4507 = vrsqrt.f32 %v67_v23  ;;  %v66_v25 = vmul.f32 0.03125, %v64_v24 }
 0x12c   :  { %v68_v27 = vadd.f32 1e-05, %v66_v25 }
 0x12e   :  { %4509 = vrsqrt.f32 %v68_v27 }
 0x134   :  { %v4508_v32 = vpop.eup %4507 }
 0x135   :  { %v71_v33 = vmul.f32 %v4508_v32, %v55_v6 }
 0x137   :  { %v77_v35 = vmul.f32 %v76_v31, %v71_v33 }
 0x138   :  { %v4510_v36 = vpop.eup %4509 }
 0x139   :  { %v72_v37 = vmul.f32 %v4510_v36, %v56_v10  ;;  %v83_v38 = vadd.f32 %v82_v34, %v77_v35 }
 0x13b   :  { %v78_v39 = vmul.f32 %v76_v31, %v72_v37  ;;  %4075 = vmatprep.mubr.msk.f32.mxu1 %vm45_vm0, %v83_v38 }
 0x13d   :  { %v84_v40 = vadd.f32 %v82_v34, %v78_v39 }
 0x13f   :  { %4076 = vmatmul.mubr.msk.f32.vlgmr.msra.gmra.mrb[0].mxu1 %vm45_vm0, %v84_v40 }
 0x140   :  { %4080 = vmatprep.mubr.msk.f32.mxu1 %vm4624_vm1, %v4623_v42 }
 0x212   :  { %v4077_v43 = vpop.f32.mrb[0].mxu1 }
 0x213   :  { %v4750_v44 = vadd.f32 %v4077_v43, %v3828_v41  ;;  %v168_v45 = vpop.f32.mrb[1].mxu1 }
 0x214   :  { %v4752_v46 = vadd.f32 %v3828_v41, %v168_v45 }
 0x215   :  { %181 = vrot.lane.b32.xlu1 %v4750_v44, %s4625_s28 }
 0x216   :  { %179 = vrot.lane.b32.xlu0 %v4752_v46, %s4625_s28 }
 0x219   :  { %183 = vrot.lane.b32.xlu1 %v4752_v46, %s4626_s29 }
 0x21a   :  { %187 = vrot.lane.b32.xlu0 %v4752_v46, %s4627_s30 }
 0x21d   :  { %185 = vrot.lane.b32.xlu1 %v4750_v44, %s4626_s29 }
 0x21e   :  { %191 = vrot.lane.b32.xlu0 %v4752_v46, %s4628_s11 }
 0x221   :  { %189 = vrot.lane.b32.xlu1 %v4750_v44, %s4627_s30 }
 0x225   :  { %268 = vrot.lane.b32.xlu1 %v4750_v44, %s4628_s11 }
 0x287   :  { %v4770_v47 = vpop.permute.xlu1 %181 }
 0x288   :  { %420 = vrot.lane.b32.xlu1 %v4770_v47, %s4628_s11  ;;  %v4774_v48 = vpop.permute.xlu0 %179 }
 0x289   :  { %344 = vrot.lane.b32.xlu0 %v4774_v48, %s4628_s11 }
 0x28b   :  { %v4778_v49 = vpop.permute.xlu1 %183 }
 0x28c   :  { %v4780_v50 = vpop.permute.xlu0 %187 }
 0x28d   :  { %496 = vrot.lane.b32.xlu0 %v4778_v49, %s4628_s11 }
 0x28f   :  { %v4784_v51 = vpop.permute.xlu1 %185 }
 0x290   :  { %572 = vrot.lane.b32.xlu1 %v4784_v51, %s4628_s11  ;;  %v192_v52 = vpop.permute.xlu0 %191 }
 0x291   :  { %648 = vrot.lane.b32.xlu0 %v4780_v50, %s4628_s11  ;;  %4079 = vmatpush3.xpose.msk.msra.mxu1 %vm193_vm2, %v192_v52 }
 0x292   :  { %4083 = vmatprep.subr.mxu1 %v4623_v42 }
 0x293   :  { %v4792_v53 = vpop.permute.xlu1 %189 }
 0x294   :  { %724 = vrot.lane.b32.xlu1 %v4792_v53, %s4628_s11  ;;  %4081 = vmatmul.mubr.msk.f32.vlgmr.msra.gmra.mrb[2].mxu1 %vm193_vm2, %v4752_v46 }
 0x295   :  { %4085 = vmatprep.mubr.msk.f32.mxu1 %vm4624_vm1, %v4623_v42 }
 0x297   :  { %v269_v54 = vpop.permute.xlu1 %268 }
 0x298   :  { %4084 = vmatpush3.xpose.msk.msra.mxu1 %vm193_vm2, %v269_v54 }
 0x299   :  { %4088 = vmatprep.subr.mxu1 %v4623_v42 }
 0x29b   :  { %4086 = vmatmul.mubr.msk.f32.vlgmr.msra.gmra.mrb[4].mxu1 %vm193_vm2, %v4750_v44 }
 0x29c   :  { %4090 = vmatprep.mubr.msk.f32.mxu1 %vm4624_vm1, %v4623_v42 }
 0x2fa   :  { %v421_v56 = vpop.permute.xlu1 %420 }
 0x2fb   :  { %v345_v55 = vpop.permute.xlu0 %344 }
 0x2fc   :  { %4089 = vmatpush3.xpose.msk.msra.mxu1 %vm193_vm2, %v345_v55 }
 0x2fd   :  { %4093 = vmatprep.subr.mxu1 %v4623_v42 }
 0x2ff   :  { %4091 = vmatmul.mubr.msk.f32.vlgmr.msra.gmra.mrb[6].mxu1 %vm193_vm2, %v4774_v48  ;;  %v497_v57 = vpop.permute.xlu0 %496 }
 0x300   :  { %4094 = vmatpush3.xpose.msk.msra.mxu1 %vm193_vm2, %v421_v56  ;;  %4099 = vmatpush3.xpose.msk.msra.mxu0 %vm193_vm2, %v497_v57 }
 0x301   :  { %4095 = vmatprep.mubr.msk.f32.mxu1 %vm4624_vm1, %v4623_v42  ;;  %4103 = vmatprep.subr.mxu1 %v4623_v42 }
 0x302   :  { %v573_v58 = vpop.permute.xlu1 %572  ;;  %4108 = vmatprep.subr.mxu0 %v4623_v42 }
 0x303   :  { %4096 = vmatmul.mubr.msk.f32.vlgmr.msra.gmra.mrb[8].mxu1 %vm193_vm2, %v4770_v47  ;;  %4101 = vmatmul.mubr.msk.f32.vlgmr.msra.gmra.mrb[0].mxu0 %vm193_vm2, %v4778_v49  ;;  %v649_v59 = vpop.permute.xlu0 %648 }
 0x304   :  { %4104 = vmatpush3.xpose.msk.msra.mxu1 %vm193_vm2, %v573_v58  ;;  %4109 = vmatpush3.xpose.msk.msra.mxu0 %vm193_vm2, %v649_v59 }
 0x305   :  { %4105 = vmatprep.mubr.msk.f32.mxu1 %vm4624_vm1, %v4623_v42  ;;  %4110 = vmatprep.mubr.msk.f32.mxu0 %vm4624_vm1, %v4623_v42 }
 0x306   :  { %v725_v60 = vpop.permute.xlu1 %724  ;;  %4113 = vmatprep.subr.mxu1 %v4623_v42  ;;  %4118 = vmatprep.subr.mxu0 %v4623_v42 }
 0x307   :  { %4106 = vmatmul.mubr.msk.f32.vlgmr.msra.gmra.mrb[10].mxu1 %vm193_vm2, %v4784_v51  ;;  %4111 = vmatmul.mubr.msk.f32.vlgmr.msra.gmra.mrb[2].mxu0 %vm193_vm2, %v4780_v50 }
 0x308   :  { %4114 = vmatpush3.xpose.msk.msra.mxu1 %vm193_vm2, %v725_v60  ;;  %4115 = vmatprep.mubr.msk.f32.mxu1 %vm4624_vm1, %v4623_v42 }
 0x309   :  { %4123 = vmatprep.subr.mxu1 %v4623_v42  ;;  %4120 = vmatprep.mubr.msk.f32.mxu0 %vm4624_vm1, %v4623_v42 }
 0x30b   :  { %4116 = vmatmul.mubr.msk.f32.vlgmr.msra.gmra.mrb[12].mxu1 %vm193_vm2, %v4792_v53 }
 0x30c   :  { %4125 = vmatprep.mubr.msk.f32.mxu1 %vm4624_vm1, %v4623_v42 }
 0x367   :  { %v264_v2 = vpop.f32.mrb[2].mxu1 }
 0x368   :  { %v265_v3 = vadd.f32 %v264_v2, %v4844_v63  ;;  %v4082_v4 = vpop.f32.mrb[3].mxu1 }
 0x36a   :  { %v800_v5 = vsel %vm193_vm2, %v265_v3, -inf }
 0x36b   :  { %801 = vmax.xlane.f32.xlu0 %v800_v5 }
 0x36e   :  { %v340_v6 = vpop.f32.mrb[4].mxu1 }
 0x36f   :  { %v341_v7 = vadd.f32 %v340_v6, %v4844_v63  ;;  %v4087_v8 = vpop.f32.mrb[5].mxu1 }
 0x371   :  { %v803_v9 = vsel %vm193_vm2, %v341_v7, -inf }
 0x372   :  { %804 = vmax.xlane.f32.xlu1 %v803_v9 }
 0x3d2   :  { %v416_v10 = vpop.f32.mrb[6].mxu1 }
 0x3d3   :  { %v417_v11 = vadd.f32 %v416_v10, %v4844_v63  ;;  %v4092_v12 = vpop.f32.mrb[7].mxu1 }
 0x3d5   :  { %v806_v13 = vsel %vm193_vm2, %v417_v11, -inf }
 0x3d6   :  { %807 = vmax.xlane.f32.xlu0 %v806_v13  ;;  %v492_v14 = vpop.f32.mrb[8].mxu1  ;;  %v568_v15 = vpop.f32.mrb[0].mxu0 }
 0x3d7   :  { %v493_v16 = vadd.f32 %v492_v14, %v4844_v63  ;;  %v4097_v17 = vpop.f32.mrb[9].mxu1  ;;  %v4102_v18 = vpop.f32.mrb[1].mxu0  ;;  %v569_v19 = vadd.f32 %v568_v15, %v4844_v63 }
 0x3d9   :  { %v809_v20 = vsel %vm193_vm2, %v493_v16, -inf  ;;  %v812_v32 = vsel %vm193_vm2, %v569_v19, -inf }
 0x3da   :  { %810 = vmax.xlane.f32.xlu0 %v809_v20  ;;  %v644_v21 = vpop.f32.mrb[10].mxu1  ;;  %v720_v22 = vpop.f32.mrb[2].mxu0 }
 0x3db   :  { %v645_v23 = vadd.f32 %v644_v21, %v4844_v63  ;;  %v4107_v24 = vpop.f32.mrb[11].mxu1  ;;  %v4112_v25 = vpop.f32.mrb[3].mxu0  ;;  %v721_v27 = vadd.f32 %v720_v22, %v4844_v63 }
 0x3dd   :  { %v815_v31 = vsel %vm193_vm2, %v645_v23, -inf  ;;  %v818_v37 = vsel %vm193_vm2, %v721_v27, -inf }
 0x3de   :  { %816 = vmax.xlane.f32.xlu1 %v815_v31  ;;  %v796_v33 = vpop.f32.mrb[12].mxu1  ;;  %813 = vmax.xlane.f32.xlu0 %v812_v32 }
 0x3df   :  { %v797_v34 = vadd.f32 %v796_v33, %v4844_v63  ;;  %v4117_v35 = vpop.f32.mrb[13].mxu1 }
 0x3e1   :  { %v821_v36 = vsel %vm193_vm2, %v797_v34, -inf }
 0x3e2   :  { %822 = vmax.xlane.f32.xlu1 %v821_v36  ;;  %819 = vmax.xlane.f32.xlu0 %v818_v37 }
 0x3f3   :  { %964 = vrot.lane.b32.xlu1 %v4750_v44, %s4630_s12 }
 0x3f7   :  { %1040 = vrot.lane.b32.xlu1 %v4774_v48, %s4630_s12 }
 0x3f8   :  { %888 = vrot.lane.b32.xlu0 %v4752_v46, %s4630_s12  ;;  %v802_v38 = vpop.xlane.xlu0 %801 }
 0x3f9   :  { %v824_v39 = vsub.f32 %v265_v3, %v802_v38 }
 0x3fb   :  { %1116 = vrot.lane.b32.xlu1 %v4770_v47, %s4630_s12  ;;  %v832_v40 = vmul.f32 1.442695, %v824_v39 }
 0x3fc   :  { %1192 = vrot.lane.b32.xlu0 %v4778_v49, %s4630_s12 }
 0x3fd   :  { %4511 = vpow2.f32 %v832_v40 }
 0x3ff   :  { %1268 = vrot.lane.b32.xlu1 %v4784_v51, %s4630_s12  ;;  %v805_v41 = vpop.xlane.xlu1 %804 }
 0x400   :  { %v825_v43 = vsub.f32 %v341_v7, %v805_v41 }
 0x402   :  { %v834_v44 = vmul.f32 1.442695, %v825_v43 }
 0x404   :  { %4513 = vpow2.f32 %v834_v44 }
 0x407   :  { %v4874_v45 = vpop.eup %4511 }
 0x408   :  { %v848_v46 = vsel %vm193_vm2, %v4874_v45, 0.0 }
 0x40e   :  { %v4878_v47 = vpop.eup %4513 }
 0x40f   :  { %v851_v48 = vsel %vm193_vm2, %v4878_v47, 0.0 }
 0x41b   :  { %849 = vadd.xlane.f32.xlu0 %v848_v46 }
 0x423   :  { %852 = vadd.xlane.f32.xlu1 %v851_v48 }
 0x463   :  { %v808_v49 = vpop.xlane.xlu0 %807 }
 0x464   :  { %v826_v51 = vsub.f32 %v417_v11, %v808_v49 }
 0x466   :  { %v836_v52 = vmul.f32 1.442695, %v826_v51 }
 0x467   :  { %v811_v54 = vpop.xlane.xlu0 %810 }
 0x468   :  { %4515 = vpow2.f32 %v836_v52  ;;  %v827_v55 = vsub.f32 %v493_v16, %v811_v54 }
 0x46a   :  { %v838_v56 = vmul.f32 1.442695, %v827_v55 }
 0x46b   :  { %v817_v57 = vpop.xlane.xlu1 %816  ;;  %v814_v58 = vpop.xlane.xlu0 %813 }
 0x46c   :  { %4517 = vpow2.f32 %v838_v56  ;;  %v829_v59 = vsub.f32 %v645_v23, %v817_v57  ;;  %v828_v60 = vsub.f32 %v569_v19, %v814_v58 }
 0x46e   :  { %v842_v61 = vmul.f32 1.442695, %v829_v59  ;;  %v840_v62 = vmul.f32 1.442695, %v828_v60 }
 0x46f   :  { %v823_v2 = vpop.xlane.xlu1 %822  ;;  %v820_v3 = vpop.xlane.xlu0 %819 }
 0x470   :  { %4519 = vpow2.f32 %v842_v61  ;;  %v831_v4 = vsub.f32 %v797_v34, %v823_v2  ;;  %v830_v5 = vsub.f32 %v721_v27, %v820_v3  ;;  %v1528_v61 = vld [vmem:[%s5424_s4] sm:$0xff]  ;;  %v1530_v3 = vld [vmem:[%s5424_s4 + $0x10] sm:$0xff] }
 0x471   :  { %4521 = vpow2.f32 %v840_v62  ;;  %v1529_v62 = vld [vmem:[%s5424_s4 + $0x8] sm:$0xff] }
 0x472   :  { %v4516_v6 = vpop.eup %4515  ;;  %v846_v7 = vmul.f32 1.442695, %v831_v4  ;;  %v844_v8 = vmul.f32 1.442695, %v830_v5  ;;  %v4382_v2 = vpack.c.bf16 %v1529_v62, %v1528_v61  ;;  %v1531_v4 = vld [vmem:[%s5424_s4 + $0x18] sm:$0xff] }
 0x473   :  { %v965_v9 = vpop.permute.xlu1 %964  ;;  %v889_v10 = vpop.permute.xlu0 %888  ;;  %v854_v11 = vsel %vm193_vm2, %v4516_v6, 0.0  ;;  %v4386_v5 = vpack.c.bf16 %v1531_v4, %v1530_v3 }
 0x474   :  { %4523 = vpow2.f32 %v846_v7  ;;  %4124 = vmatpush3.msra.mxu1 %v965_v9  ;;  %855 = vadd.xlane.f32.xlu0 %v854_v11 }
 0x475   :  { %4525 = vpow2.f32 %v844_v8  ;;  %4119 = vmatpush3.msra.mxu0 %v889_v10  ;;  %4133 = vmatprep.subr.mxu1 %v4623_v42 }
 0x476   :  { %v4518_v12 = vpop.eup %4517  ;;  %4128 = vmatprep.subr.mxu0 %v4623_v42 }
 0x477   :  { %v857_v13 = vsel %vm193_vm2, %v4518_v12, 0.0  ;;  %v1041_v22 = vpop.permute.xlu1 %1040  ;;  %v1193_v23 = vpop.permute.xlu0 %1192 }
 0x478   :  { %858 = vadd.xlane.f32.xlu1 %v857_v13 }
 0x47a   :  { %v4520_v14 = vpop.eup %4519 }
 0x47b   :  { %v4522_v15 = vpop.eup %4521  ;;  %v863_v16 = vsel %vm193_vm2, %v4520_v14, 0.0  ;;  %v1117_v24 = vpop.permute.xlu1 %1116 }
 0x47c   :  { %864 = vadd.xlane.f32.xlu1 %v863_v16  ;;  %v860_v17 = vsel %vm193_vm2, %v4522_v15, 0.0 }
 0x47d   :  { %861 = vadd.xlane.f32.xlu0 %v860_v17 }
 0x47e   :  { %v4888_v18 = vpop.eup %4523 }
 0x47f   :  { %v4890_v19 = vpop.eup %4525  ;;  %v869_v20 = vsel %vm193_vm2, %v4888_v18, 0.0  ;;  %v1269_v27 = vpop.permute.xlu1 %1268 }
 0x480   :  { %870 = vadd.xlane.f32.xlu1 %v869_v20  ;;  %v866_v21 = vsel %vm193_vm2, %v4890_v19, 0.0 }
 0x481   :  { %867 = vadd.xlane.f32.xlu0 %v866_v21 }
 0x491   :  { %1420 = vrot.lane.b32.xlu1 %v4792_v53, %s4630_s12 }
 0x497   :  { %1344 = vrot.lane.b32.xlu0 %v4780_v50, %s4630_s12 }
 0x4a8   :  { %v850_v25 = vpop.xlane.xlu0 %849 }
 0x4a9   :  { %4527 = vrcp.f32 %v850_v25 }
 0x4b0   :  { %v853_v31 = vpop.xlane.xlu1 %852 }
 0x4b1   :  { %4529 = vrcp.f32 %v853_v31 }
 0x4b3   :  { %v4528_v32 = vpop.eup %4527 }
 0x4b4   :  { %v873_v33 = vmul.f32 %v4528_v32, %v4874_v45 }
 0x4b6   :  { %4121 = vmatmul.mubr.msk.f32.vlgmr.msra.gmra.mrb[4].mxu0 %vm193_vm2, %v873_v33 }
 0x4b7   :  { %4129 = vmatpush3.msra.mxu0 %v1041_v22  ;;  %4130 = vmatprep.mubr.msk.f32.mxu0 %vm4624_vm1, %v4623_v42 }
 0x4b8   :  { %4138 = vmatprep.subr.mxu0 %v4623_v42 }
 0x4bb   :  { %v4530_v50 = vpop.eup %4529 }
 0x4bc   :  { %v875_v53 = vmul.f32 %v4530_v50, %v4878_v47  ;;  %v1534_v50 = vsub.s32 4, %v4722_v26 }
 0x4be   :  { %4126 = vmatmul.mubr.msk.f32.vlgmr.msra.gmra.mrb[14].mxu1 %vm193_vm2, %v875_v53  ;;  %v1535_v53 = vrot.slane %v4730_v29, %v1534_v50 }
 0x4bf   :  { %4134 = vmatpush3.msra.mxu1 %v1117_v24  ;;  %4135 = vmatprep.mubr.msk.f32.mxu1 %vm4624_vm1, %v4623_v42 }
 0x4c0   :  { %4143 = vmatprep.subr.mxu1 %v4623_v42 }
 0x501   :  { %v856_v34 = vpop.xlane.xlu0 %855 }
 0x502   :  { %4531 = vrcp.f32 %v856_v34 }
 0x505   :  { %v859_v35 = vpop.xlane.xlu1 %858 }
 0x506   :  { %4533 = vrcp.f32 %v859_v35 }
 0x509   :  { %v865_v36 = vpop.xlane.xlu1 %864 }
 0x50a   :  { %4535 = vrcp.f32 %v865_v36  ;;  %v862_v37 = vpop.xlane.xlu0 %861 }
 0x50b   :  { %4537 = vrcp.f32 %v862_v37 }
 0x50c   :  { %v4532_v38 = vpop.eup %4531 }
 0x50d   :  { %v877_v39 = vmul.f32 %v4532_v38, %v4516_v6  ;;  %v871_v40 = vpop.xlane.xlu1 %870 }
 0x50e   :  { %4539 = vrcp.f32 %v871_v40  ;;  %v868_v41 = vpop.xlane.xlu0 %867 }
 0x50f   :  { %4541 = vrcp.f32 %v868_v41  ;;  %4131 = vmatmul.mubr.msk.f32.vlgmr.msra.gmra.mrb[6].mxu0 %vm193_vm2, %v877_v39 }
 0x510   :  { %v4534_v43 = vpop.eup %4533  ;;  %4139 = vmatpush3.msra.mxu0 %v1193_v23  ;;  %4140 = vmatprep.mubr.msk.f32.mxu0 %vm4624_vm1, %v4623_v42 }
 0x511   :  { %v879_v44 = vmul.f32 %v4534_v43, %v4518_v12  ;;  %4148 = vmatprep.subr.mxu0 %v4623_v42  ;;  %v1421_v49 = vpop.permute.xlu1 %1420 }
 0x512   :  { %v1345_v52 = vpop.permute.xlu0 %1344 }
 0x513   :  { %4136 = vmatmul.mubr.msk.f32.vlgmr.msra.gmra.mrb[16].mxu1 %vm193_vm2, %v879_v44 }
 0x514   :  { %v4536_v45 = vpop.eup %4535  ;;  %4144 = vmatpush3.msra.mxu1 %v1269_v27  ;;  %4145 = vmatprep.mubr.msk.f32.mxu1 %vm4624_vm1, %v4623_v42 }
 0x515   :  { %v4538_v46 = vpop.eup %4537  ;;  %v883_v47 = vmul.f32 %v4536_v45, %v4520_v14  ;;  %4153 = vmatprep.subr.mxu1 %v4623_v42 }
 0x516   :  { %v881_v48 = vmul.f32 %v4538_v46, %v4522_v15 }
 0x517   :  { %4146 = vmatmul.mubr.msk.f32.vlgmr.msra.gmra.mrb[18].mxu1 %vm193_vm2, %v883_v47 }
 0x518   :  { %v4540_v51 = vpop.eup %4539  ;;  %4141 = vmatmul.mubr.msk.f32.vlgmr.msra.gmra.mrb[8].mxu0 %vm193_vm2, %v881_v48  ;;  %4154 = vmatpush3.msra.mxu1 %v1421_v49 }
 0x519   :  { %v4542_v54 = vpop.eup %4541  ;;  %v887_v55 = vmul.f32 %v4540_v51, %v4888_v18  ;;  %4149 = vmatpush3.msra.mxu0 %v1345_v52  ;;  %4150 = vmatprep.mubr.msk.f32.mxu0 %vm4624_vm1, %v4623_v42  ;;  %v1657_v52 = vld [vmem:[%s5425_s5] sm:$0xff] }
 0x51a   :  { %v885_v56 = vmul.f32 %v4542_v54, %v4890_v19  ;;  %4155 = vmatprep.mubr.msk.f32.mxu1 %vm4624_vm1, %v4623_v42  ;;  %4383 = vmatprep.subr.bf16.mxu0 %v4382_v2  ;;  %v1658_v54 = vld [vmem:[%s5425_s5 + $0x8] sm:$0xff] }
 0x51b   :  { %4156 = vmatmul.mubr.msk.f32.vlgmr.msra.gmra.mrb[20].mxu1 %vm193_vm2, %v887_v55  ;;  %v4390_v55 = vpack.c.bf16 %v1658_v54, %v1657_v52 }
 0x51c   :  { %4151 = vmatmul.mubr.msk.f32.vlgmr.msra.gmra.mrb[10].mxu0 %vm193_vm2, %v885_v56  ;;  %v1659_v56 = vld [vmem:[%s5425_s5 + $0x10] sm:$0xff] }
 0x51d   :  { %4385 = vmatpush3.bf16.msra.mxu0 %v4382_v2  ;;  %4391 = vmatprep.subr.bf16.mxu1 %v4390_v55 }
 0x51e   :  { %4387 = vmatprep.subr.bf16.mxu0 %v4386_v5  ;;  %4393 = vmatpush3.bf16.msra.mxu1 %v4390_v55 }
 0x521   :  { %4389 = vmatpush3.bf16.msra.mxu0 %v4386_v5 }
 0x589   :  { %v960_v57 = vpop.f32.mrb[4].mxu0 }
 0x58a   :  { %v4122_v58 = vpop.f32.mrb[5].mxu0 }
 0x591   :  { %v1036_v59 = vpop.f32.mrb[14].mxu1 }
 0x592   :  { %v4127_v60 = vpop.f32.mrb[15].mxu1 }
 0x593   :  { %v1768_v60 = vld [vmem:[%s5427_s7 + $0x8] sm:$0xff] }
 0x5e2   :  { %v1112_v6 = vpop.f32.mrb[6].mxu0 }
 0x5e3   :  { %1498 = vrot.lane.b32.xlu0 %v1112_v6, %s4631_s20  ;;  %v4132_v7 = vpop.f32.mrb[7].mxu0 }
 0x5e4   :  { %v1647_v7 = vsub.s32 2, %v4722_v26 }
 0x5e6   :  { %v1188_v8 = vpop.f32.mrb[16].mxu1 }
 0x5e7   :  { %1500 = vrot.lane.b32.xlu1 %v1188_v8, %s4631_s20  ;;  %v4137_v9 = vpop.f32.mrb[17].mxu1  ;;  %v1653_v8 = vsub.s32 3, %v4722_v26 }
 0x5e8   :  { %v1648_v9 = vrot.slane %v4730_v29, %v1647_v7 }
 0x5ea   :  { %v1340_v10 = vpop.f32.mrb[18].mxu1 }
 0x5eb   :  { %v1264_v11 = vpop.f32.mrb[8].mxu0  ;;  %1508 = vrot.lane.b32.xlu1 %v1340_v10, %s4632_s21  ;;  %v4147_v12 = vpop.f32.mrb[19].mxu1 }
 0x5ec   :  { %1506 = vrot.lane.b32.xlu0 %v1264_v11, %s4632_s21  ;;  %v4142_v13 = vpop.f32.mrb[9].mxu0  ;;  %v1654_v12 = vrot.slane %v4730_v29, %v1653_v8 }
 0x5ee   :  { %v1492_v14 = vpop.f32.mrb[20].mxu1 }
 0x5ef   :  { %v1416_v15 = vpop.f32.mrb[10].mxu0  ;;  %1516 = vrot.lane.b32.xlu1 %v1492_v14, %s4633_s22  ;;  %v4157_v16 = vpop.f32.mrb[21].mxu1 }
 0x5f0   :  { %1514 = vrot.lane.b32.xlu0 %v1416_v15, %s4633_s22  ;;  %v4152_v17 = vpop.f32.mrb[11].mxu0 }
 0x655   :  { %v1499_v19 = vpop.permute.xlu0 %1498 }
 0x656   :  { %v1520_v23 = vsel %vm193_vm2, %v960_v57, %v1499_v19  ;;  %v1660_v57 = vld [vmem:[%s5425_s5 + $0x18] sm:$0xff]  ;;  %v1769_v19 = vld [vmem:[%s5427_s7 + $0x10] sm:$0xff] }
 0x657   :  { %v4394_v58 = vpack.c.bf16 %v1660_v57, %v1659_v56 }
 0x659   :  { %v1501_v18 = vpop.permute.xlu1 %1500  ;;  %4395 = vmatprep.subr.bf16.mxu1 %v4394_v58 }
 0x65a   :  { %v1521_v22 = vsel %vm193_vm2, %v1036_v59, %v1501_v18  ;;  %4397 = vmatpush3.bf16.msra.mxu1 %v4394_v58  ;;  %v1767_v59 = vld [vmem:[%s5427_s7] sm:$0xff] }
 0x65b   :  { %v4398_v61 = vpack.c.bf16 %v1768_v60, %v1767_v59 }
 0x65d   :  { %v1509_v20 = vpop.permute.xlu1 %1508  ;;  %4399 = vmatprep.subr.bf16.mxu0 %v4398_v61 }
 0x65e   :  { %v1507_v21 = vpop.permute.xlu0 %1506  ;;  %v1524_v24 = vsel %vm1522_vm4, %v1521_v22, %v1509_v20  ;;  %v1770_v20 = vld [vmem:[%s5427_s7 + $0x18] sm:$0xff]  ;;  %v1771_v22 = vld [vmem:[%s5427_s7 + $0x20] sm:$0xff] }
 0x65f   :  { %v1523_v27 = vsel %vm1522_vm4, %v1520_v23, %v1507_v21  ;;  %v4402_v21 = vpack.c.bf16 %v1770_v20, %v1769_v19  ;;  %v1772_v23 = vld [vmem:[%s5427_s7 + $0x28] sm:$0xff] }
 0x661   :  { %v1517_v25 = vpop.permute.xlu1 %1516 }
 0x662   :  { %v1527_v31 = vsel %vm1525_vm5, %v1524_v24, %v1517_v25  ;;  %v1515_v32 = vpop.permute.xlu0 %1514  ;;  %v4406_v24 = vpack.c.bf16 %v1772_v23, %v1771_v22  ;;  %v1773_v25 = vld [vmem:[%s5427_s7 + $0x30] sm:$0xff] }
 0x663   :  { %v1526_v33 = vsel %vm1525_vm5, %v1523_v27, %v1515_v32  ;;  %v1774_v27 = vld [vmem:[%s5427_s7 + $0x38] sm:$0xff]  ;;  %v1775_v32 = vld [vmem:[%s5427_s7 + $0x40] sm:$0xff] }
 0x664   :  { %4166 = vmatprep.mubr.msk.f32.mxu0 %vm45_vm0, %v1526_v33  ;;  %v1776_v33 = vld [vmem:[%s5427_s7 + $0x48] sm:$0xff] }
 0x665   :  { %4167 = vmatmul.mubr.msk.f32.vlgmr.msra.gmra.mrb[12].mxu0 %vm45_vm0, %v1527_v31  ;;  %v4410_v31 = vpack.c.bf16 %v1774_v27, %v1773_v25 }
 0x666   :  { %4401 = vmatpush3.bf16.msra.mxu0 %v4398_v61 }
 0x667   :  { %4403 = vmatprep.subr.bf16.mxu0 %v4402_v21 }
 0x66a   :  { %4405 = vmatpush3.bf16.msra.mxu0 %v4402_v21 }
 0x66b   :  { %4407 = vmatprep.subr.bf16.mxu0 %v4406_v24 }
 0x66e   :  { %4409 = vmatpush3.bf16.msra.mxu0 %v4406_v24 }
 0x66f   :  { %4411 = vmatprep.subr.bf16.mxu0 %v4410_v31 }
 0x672   :  { %4413 = vmatpush3.bf16.msra.mxu0 %v4410_v31  ;;  %v3861_v31 = vld [vmem:[%s5422_s2 + $0x20] sm:$0xff] }
 0x738   :  { %v4168_v34 = vpop.f32.mrb[12].mxu0 }
 0x739   :  { %v1614_v35 = vadd.f32 %v4168_v34, %v1535_v53  ;;  %v1608_v36 = vpop.f32.mrb[13].mxu0  ;;  %v1777_v34 = vld [vmem:[%s5427_s7 + $0x50] sm:$0xff] }
 0x73a   :  { %v1609_v37 = vadd.f32 %v1608_v36, %v1535_v53  ;;  %v4414_v53 = vpack.c.bf16 %v1776_v33, %v1775_v32  ;;  %v3862_v32 = vld [vmem:[%s5422_s2 + $0x28] sm:$0xff] }
 0x73b   :  { %v4959_v38 = vadd.f32 %v1614_v35, %v4699_v1  ;;  %v1778_v35 = vld [vmem:[%s5427_s7 + $0x58] sm:$0xff]  ;;  %v4430_v33 = vpack.c.bf16 %v3862_v32, %v3861_v31 }
 0x73c   :  { %v4962_v39 = vadd.f32 %v1609_v37, %v4694_v0  ;;  %4415 = vmatprep.subr.bf16.mxu0 %v4414_v53  ;;  %v4418_v36 = vpack.c.bf16 %v1778_v35, %v1777_v34  ;;  %v1779_v37 = vld [vmem:[%s5427_s7 + $0x60] sm:$0xff]  ;;  %v3864_v34 = vld [vmem:[%s5422_s2 + $0x38] sm:$0xff] }
 0x73d   :  { %v1622_v40 = vsel %vm45_vm0, %v4959_v38, 0.0  ;;  %4417 = vmatpush3.bf16.msra.mxu0 %v4414_v53  ;;  %v3863_v53 = vld [vmem:[%s5422_s2 + $0x30] sm:$0xff]  ;;  %4431 = vmatprep.subr.bf16.mxu1 %v4430_v33 }
 0x73e   :  { %1623 = vadd.xlane.f32.xlu1 %v1622_v40  ;;  %v1619_v41 = vsel %vm45_vm0, %v4962_v39, 0.0  ;;  %v1780_v40 = vld [vmem:[%s5427_s7 + $0x68] sm:$0xff]  ;;  %4419 = vmatprep.subr.bf16.mxu0 %v4418_v36  ;;  %v4434_v35 = vpack.c.bf16 %v3864_v34, %v3863_v53 }
 0x73f   :  { %1620 = vadd.xlane.f32.xlu0 %v1619_v41  ;;  %v4422_v41 = vpack.c.bf16 %v1780_v40, %v1779_v37 }
 0x741   :  { %4421 = vmatpush3.bf16.msra.mxu0 %v4418_v36 }
 0x742   :  { %4423 = vmatprep.subr.bf16.mxu0 %v4422_v41 }
 0x745   :  { %4425 = vmatpush3.bf16.msra.mxu0 %v4422_v41 }
 0x7cb   :  { %v1624_v43 = vpop.xlane.xlu1 %1623 }
 0x7cc   :  { %v1626_v44 = vmul.f32 0.03125, %v1624_v43  ;;  %v1621_v45 = vpop.xlane.xlu0 %1620  ;;  %v1781_v43 = vld [vmem:[%s5427_s7 + $0x70] sm:$0xff] }
 0x7cd   :  { %v1625_v46 = vmul.f32 0.03125, %v1621_v45 }
 0x7ce   :  { %v1628_v47 = vsub.f32 %v4959_v38, %v1626_v44  ;;  %v1782_v44 = vld [vmem:[%s5427_s7 + $0x78] sm:$0xff] }
 0x7cf   :  { %v1627_v1 = vsub.f32 %v4962_v39, %v1625_v46  ;;  %v4426_v45 = vpack.c.bf16 %v1782_v44, %v1781_v43  ;;  %v3857_v46 = vld [vmem:[%s5426_s6] ss:$0 sm:$0xff] }
 0x7d0   :  { %v1630_v49 = vmul.f32 %v1628_v47, %v1628_v47 }
 0x7d1   :  { %v1629_v48 = vmul.f32 %v1627_v1, %v1627_v1  ;;  %4427 = vmatprep.subr.bf16.mxu0 %v4426_v45 }
 0x7d2   :  { %v1634_v51 = vsel %vm45_vm0, %v1630_v49, 0.0  ;;  %4429 = vmatpush3.bf16.msra.mxu0 %v4426_v45  ;;  %v5082_v45 = vld [vmem:[%s5421_s1 + $0x8] sm:$0x3f] }
 0x7d3   :  { %v1631_v0 = vsel %vm45_vm0, %v1629_v48, 0.0  ;;  %4256 = vmatprep.subr.mxu0 %v4623_v42 }
 0x7d4   :  { %1632 = vadd.xlane.f32.xlu0 %v1631_v0 }
 0x7d8   :  { %1635 = vadd.xlane.f32.xlu0 %v1634_v51 }
 0x861   :  { %v1633_v62 = vpop.xlane.xlu0 %1632 }
 0x862   :  { %v1637_v2 = vmul.f32 0.03125, %v1633_v62 }
 0x864   :  { %v1639_v3 = vadd.f32 1e-05, %v1637_v2 }
 0x865   :  { %v1636_v4 = vpop.xlane.xlu0 %1635 }
 0x866   :  { %4543 = vrsqrt.f32 %v1639_v3  ;;  %v1638_v5 = vmul.f32 0.03125, %v1636_v4 }
 0x868   :  { %v1640_v6 = vadd.f32 1e-05, %v1638_v5 }
 0x86a   :  { %4545 = vrsqrt.f32 %v1640_v6 }
 0x870   :  { %v4544_v10 = vpop.eup %4543 }
 0x871   :  { %v1643_v11 = vmul.f32 %v4544_v10, %v1627_v1  ;;  %v1785_v10 = vsub.s32 5, %v4722_v26 }
 0x873   :  { %v1649_v13 = vmul.f32 %v1648_v9, %v1643_v11  ;;  %v1786_v11 = vrot.slane %v4730_v29, %v1785_v10 }
 0x874   :  { %v4546_v14 = vpop.eup %4545 }
 0x875   :  { %v1644_v15 = vmul.f32 %v4546_v14, %v1628_v47  ;;  %v1655_v16 = vadd.f32 %v1654_v12, %v1649_v13 }
 0x877   :  { %v1650_v17 = vmul.f32 %v1648_v9, %v1644_v15  ;;  %4177 = vmatprep.mubr.msk.f32.mxu1 %vm45_vm0, %v1655_v16 }
 0x879   :  { %v1656_v18 = vadd.f32 %v1654_v12, %v1650_v17 }
 0x87b   :  { %4178 = vmatmul.mubr.msk.f32.vlgmr.msra.gmra.mrb[22].mxu1 %vm45_vm0, %v1656_v18 }
 0x87c   :  { %4433 = vmatpush3.bf16.msra.mxu1 %v4430_v33 }
 0x87d   :  { %4435 = vmatprep.subr.bf16.mxu1 %v4434_v35 }
 0x880   :  { %4437 = vmatpush3.bf16.msra.mxu1 %v4434_v35 }
 0x881   :  { %4226 = vmatprep.subr.mxu1 %v4623_v42 }
 0x94e   :  { %v4179_v47 = vpop.f32.mrb[22].mxu1 }
 0x94f   :  { %v1746_v1 = vadd.f32 %v4179_v47, %v3857_v46  ;;  %v1740_v48 = vpop.f32.mrb[23].mxu1 }
 0x950   :  { %v1741_v0 = vadd.f32 %v3857_v46, %v1740_v48  ;;  %v1895_v46 = vrot.slane %v5082_v45, %v4725_v28 }
 0x951   :  { %v1752_v49 = vmul.f32 0.044715, %v1746_v1  ;;  %v1750_v5 = vmul.f32 0.5, %v1746_v1 }
 0x952   :  { %v1751_v51 = vmul.f32 0.044715, %v1741_v0  ;;  %v1749_v3 = vmul.f32 0.5, %v1741_v0 }
 0x953   :  { %v1754_v52 = vmul.f32 %v1752_v49, %v1746_v1  ;;  %v1901_v49 = vrot.slane %v5082_v45, %v4733_v30 }
 0x954   :  { %v1753_v54 = vmul.f32 %v1751_v51, %v1741_v0 }
 0x955   :  { %v1756_v55 = vmul.f32 %v1754_v52, %v1746_v1 }
 0x956   :  { %v1755_v56 = vmul.f32 %v1753_v54, %v1741_v0 }
 0x957   :  { %v1758_v57 = vadd.f32 %v1756_v55, %v1746_v1 }
 0x958   :  { %v1757_v58 = vadd.f32 %v1755_v56, %v1741_v0  ;;  %v3866_v56 = vld [vmem:[%s5423_s3 + $0x1] ss:$0 sm:$0xff] }
 0x959   :  { %v1760_v59 = vmul.f32 0.7978846, %v1758_v57 }
 0x95a   :  { %v1759_v60 = vmul.f32 0.7978846, %v1757_v58 }
 0x95b   :  { %4547 = vtanh.f32 %v1760_v59 }
 0x95c   :  { %4549 = vtanh.f32 %v1759_v60 }
 0x965   :  { %v4548_v61 = vpop.eup %4547 }
 0x966   :  { %v4550_v62 = vpop.eup %4549  ;;  %v1764_v2 = vadd.f32 1.0, %v4548_v61 }
 0x967   :  { %v1763_v4 = vadd.f32 1.0, %v4550_v62 }
 0x968   :  { %v1766_v9 = vmul.f32 %v1764_v2, %v1750_v5 }
 0x969   :  { %v1765_v6 = vmul.f32 %v1763_v4, %v1749_v3 }
 0x96b   :  { %4212 = vmatprep.mubr.f32.mxu0 %v1765_v6 }
 0x96c   :  { %4213 = vmatmul.mubr.f32.vlgmr.msra.gmra.mrb[14].mxu0 %v1766_v9 }
 0x96d   :  { %4258 = vmatprep.mubr.msk.f32.mxu0 %vm4624_vm1, %v4623_v42 }
 0xa3f   :  { %v4214_v12 = vpop.f32.mrb[14].mxu0 }
 0xa40   :  { %v1859_v13 = vadd.f32 %v4214_v12, %v1786_v11  ;;  %v1853_v14 = vpop.f32.mrb[15].mxu0 }
 0xa41   :  { %v1854_v15 = vadd.f32 %v1853_v14, %v1786_v11 }
 0xa42   :  { %v5053_v16 = vadd.f32 %v1859_v13, %v4959_v38 }
 0xa43   :  { %v5056_v17 = vadd.f32 %v1854_v15, %v4962_v39 }
 0xa44   :  { %v1869_v18 = vsel %vm45_vm0, %v5053_v16, 0.0 }
 0xa45   :  { %1870 = vadd.xlane.f32.xlu1 %v1869_v18  ;;  %v1866_v19 = vsel %vm45_vm0, %v5056_v17, 0.0 }
 0xa46   :  { %1867 = vadd.xlane.f32.xlu0 %v1866_v19 }
 0xad2   :  { %v1871_v20 = vpop.xlane.xlu1 %1870 }
 0xad3   :  { %v1873_v29 = vmul.f32 0.03125, %v1871_v20  ;;  %v1868_v21 = vpop.xlane.xlu0 %1867 }
 0xad4   :  { %v1872_v22 = vmul.f32 0.03125, %v1868_v21 }
 0xad5   :  { %v1875_v23 = vsub.f32 %v5053_v16, %v1873_v29 }
 0xad6   :  { %v1874_v38 = vsub.f32 %v5056_v17, %v1872_v22 }
 0xad7   :  { %v1877_v24 = vmul.f32 %v1875_v23, %v1875_v23 }
 0xad8   :  { %v1876_v25 = vmul.f32 %v1874_v38, %v1874_v38 }
 0xad9   :  { %v1881_v39 = vsel %vm45_vm0, %v1877_v24, 0.0 }
 0xada   :  { %1882 = vadd.xlane.f32.xlu1 %v1881_v39  ;;  %v1878_v27 = vsel %vm45_vm0, %v1876_v25, 0.0 }
 0xadb   :  { %1879 = vadd.xlane.f32.xlu0 %v1878_v27 }
 0xb67   :  { %v1883_v36 = vpop.xlane.xlu1 %1882 }
 0xb68   :  { %v1885_v37 = vmul.f32 0.03125, %v1883_v36  ;;  %v1880_v40 = vpop.xlane.xlu0 %1879 }
 0xb69   :  { %v1884_v41 = vmul.f32 0.03125, %v1880_v40 }
 0xb6a   :  { %v1887_v43 = vadd.f32 1e-05, %v1885_v37 }
 0xb6b   :  { %v1886_v44 = vadd.f32 1e-05, %v1884_v41 }
 0xb6c   :  { %4551 = vrsqrt.f32 %v1887_v43 }
 0xb6d   :  { %4553 = vrsqrt.f32 %v1886_v44 }
 0xb76   :  { %v4552_v47 = vpop.eup %4551 }
 0xb77   :  { %v4554_v1 = vpop.eup %4553  ;;  %v1891_v48 = vmul.f32 %v4552_v47, %v1875_v23 }
 0xb78   :  { %v1890_v0 = vmul.f32 %v4554_v1, %v1874_v38 }
 0xb79   :  { %v1897_v51 = vmul.f32 %v1895_v46, %v1891_v48 }
 0xb7a   :  { %v1896_v52 = vmul.f32 %v1895_v46, %v1890_v0 }
 0xb7b   :  { %v1903_v55 = vadd.f32 %v1901_v49, %v1897_v51 }
 0xb7c   :  { %v1902_v54 = vadd.f32 %v1901_v49, %v1896_v52 }
 0xb7e   :  { %4223 = vmatprep.mubr.msk.f32.mxu1 %vm45_vm0, %v1902_v54 }
 0xb7f   :  { %4224 = vmatmul.mubr.msk.f32.vlgmr.msra.gmra.mrb[24].mxu1 %vm45_vm0, %v1903_v55 }
 0xb80   :  { %4228 = vmatprep.mubr.msk.f32.mxu1 %vm4624_vm1, %v4623_v42 }
 0xc52   :  { %v4225_v57 = vpop.f32.mrb[24].mxu1 }
 0xc53   :  { %v5095_v58 = vadd.f32 %v4225_v57, %v3866_v56  ;;  %v1989_v59 = vpop.f32.mrb[25].mxu1 }
 0xc54   :  { %v5097_v60 = vadd.f32 %v3866_v56, %v1989_v59 }
 0xc55   :  { %2002 = vrot.lane.b32.xlu1 %v5095_v58, %s4625_s28 }
 0xc56   :  { %2000 = vrot.lane.b32.xlu0 %v5097_v60, %s4625_s28 }
 0xc59   :  { %2004 = vrot.lane.b32.xlu1 %v5097_v60, %s4626_s29 }
 0xc5a   :  { %2008 = vrot.lane.b32.xlu0 %v5097_v60, %s4627_s30 }
 0xc5d   :  { %2006 = vrot.lane.b32.xlu1 %v5095_v58, %s4626_s29 }
 0xc5e   :  { %2012 = vrot.lane.b32.xlu0 %v5097_v60, %s4628_s11 }
 0xc61   :  { %2010 = vrot.lane.b32.xlu1 %v5095_v58, %s4627_s30 }
 0xc65   :  { %2088 = vrot.lane.b32.xlu1 %v5095_v58, %s4628_s11 }
 0xcc7   :  { %v5115_v61 = vpop.permute.xlu1 %2002 }
 0xcc8   :  { %2240 = vrot.lane.b32.xlu1 %v5115_v61, %s4628_s11  ;;  %v5119_v62 = vpop.permute.xlu0 %2000 }
 0xcc9   :  { %2164 = vrot.lane.b32.xlu0 %v5119_v62, %s4628_s11 }
 0xccb   :  { %v5123_v2 = vpop.permute.xlu1 %2004 }
 0xccc   :  { %v5125_v3 = vpop.permute.xlu0 %2008 }
 0xccd   :  { %2316 = vrot.lane.b32.xlu0 %v5123_v2, %s4628_s11 }
 0xccf   :  { %v5129_v4 = vpop.permute.xlu1 %2006 }
 0xcd0   :  { %2392 = vrot.lane.b32.xlu1 %v5129_v4, %s4628_s11  ;;  %v2013_v5 = vpop.permute.xlu0 %2012 }
 0xcd1   :  { %2468 = vrot.lane.b32.xlu0 %v5125_v3, %s4628_s11  ;;  %4227 = vmatpush3.xpose.msk.msra.mxu1 %vm193_vm2, %v2013_v5 }
 0xcd2   :  { %4231 = vmatprep.subr.mxu1 %v4623_v42 }
 0xcd3   :  { %v5137_v6 = vpop.permute.xlu1 %2010 }
 0xcd4   :  { %2544 = vrot.lane.b32.xlu1 %v5137_v6, %s4628_s11  ;;  %4229 = vmatmul.mubr.msk.f32.vlgmr.msra.gmra.mrb[26].mxu1 %vm193_vm2, %v5097_v60 }
 0xcd5   :  { %4233 = vmatprep.mubr.msk.f32.mxu1 %vm4624_vm1, %v4623_v42 }
 0xcd7   :  { %v2089_v9 = vpop.permute.xlu1 %2088 }
 0xcd8   :  { %4232 = vmatpush3.xpose.msk.msra.mxu1 %vm193_vm2, %v2089_v9 }
 0xcd9   :  { %4236 = vmatprep.subr.mxu1 %v4623_v42 }
 0xcdb   :  { %4234 = vmatmul.mubr.msk.f32.vlgmr.msra.gmra.mrb[28].mxu1 %vm193_vm2, %v5095_v58 }
 0xcdc   :  { %4238 = vmatprep.mubr.msk.f32.mxu1 %vm4624_vm1, %v4623_v42 }
 0xd3a   :  { %v2241_v12 = vpop.permute.xlu1 %2240 }
 0xd3b   :  { %v2165_v11 = vpop.permute.xlu0 %2164 }
 0xd3c   :  { %4237 = vmatpush3.xpose.msk.msra.mxu1 %vm193_vm2, %v2165_v11 }
 0xd3d   :  { %4241 = vmatprep.subr.mxu1 %v4623_v42 }
 0xd3f   :  { %4239 = vmatmul.mubr.msk.f32.vlgmr.msra.gmra.mrb[30].mxu1 %vm193_vm2, %v5119_v62  ;;  %v2317_v13 = vpop.permute.xlu0 %2316 }
 0xd40   :  { %4242 = vmatpush3.xpose.msk.msra.mxu1 %vm193_vm2, %v2241_v12  ;;  %4243 = vmatprep.mubr.msk.f32.mxu1 %vm4624_vm1, %v4623_v42 }
 0xd41   :  { %4246 = vmatprep.subr.mxu1 %v4623_v42 }
 0xd42   :  { %v2393_v15 = vpop.permute.xlu1 %2392 }
 0xd43   :  { %4244 = vmatmul.mubr.msk.f32.vlgmr.msra.gmra.mrb[32].mxu1 %vm193_vm2, %v5115_v61  ;;  %v2469_v14 = vpop.permute.xlu0 %2468 }
 0xd44   :  { %4247 = vmatpush3.xpose.msk.msra.mxu1 %vm193_vm2, %v2317_v13  ;;  %4257 = vmatpush3.xpose.msk.msra.mxu0 %vm193_vm2, %v2469_v14 }
 0xd45   :  { %4248 = vmatprep.mubr.msk.f32.mxu1 %vm4624_vm1, %v4623_v42  ;;  %4251 = vmatprep.subr.mxu1 %v4623_v42 }
 0xd46   :  { %4266 = vmatprep.subr.mxu0 %v4623_v42  ;;  %v2545_v18 = vpop.permute.xlu1 %2544 }
 0xd47   :  { %4249 = vmatmul.mubr.msk.f32.vlgmr.msra.gmra.mrb[34].mxu1 %vm193_vm2, %v5123_v2  ;;  %4259 = vmatmul.mubr.msk.f32.vlgmr.msra.gmra.mrb[16].mxu0 %vm193_vm2, %v5125_v3 }
 0xd48   :  { %4252 = vmatpush3.xpose.msk.msra.mxu1 %vm193_vm2, %v2393_v15  ;;  %4253 = vmatprep.mubr.msk.f32.mxu1 %vm4624_vm1, %v4623_v42 }
 0xd49   :  { %4261 = vmatprep.subr.mxu1 %v4623_v42  ;;  %4268 = vmatprep.mubr.msk.f32.mxu0 %vm4624_vm1, %v4623_v42 }
 0xd4b   :  { %4254 = vmatmul.mubr.msk.f32.vlgmr.msra.gmra.mrb[36].mxu1 %vm193_vm2, %v5129_v4 }
 0xd4c   :  { %4262 = vmatpush3.xpose.msk.msra.mxu1 %vm193_vm2, %v2545_v18  ;;  %4263 = vmatprep.mubr.msk.f32.mxu1 %vm4624_vm1, %v4623_v42 }
 0xd4d   :  { %4271 = vmatprep.subr.mxu1 %v4623_v42 }
 0xd4f   :  { %4264 = vmatmul.mubr.msk.f32.vlgmr.msra.gmra.mrb[38].mxu1 %vm193_vm2, %v5137_v6 }
 0xd50   :  { %4273 = vmatprep.mubr.msk.f32.mxu1 %vm4624_vm1, %v4623_v42 }
 0xda7   :  { %v2084_v19 = vpop.f32.mrb[26].mxu1 }
 0xda8   :  { %v2085_v20 = vadd.f32 %v2084_v19, %v4844_v63  ;;  %v4230_v29 = vpop.f32.mrb[27].mxu1 }
 0xdaa   :  { %v2620_v21 = vsel %vm193_vm2, %v2085_v20, -inf }
 0xdab   :  { %2621 = vmax.xlane.f32.xlu0 %v2620_v21 }
 0xdae   :  { %v2160_v22 = vpop.f32.mrb[28].mxu1 }
 0xdaf   :  { %v2161_v23 = vadd.f32 %v2160_v22, %v4844_v63  ;;  %v4235_v38 = vpop.f32.mrb[29].mxu1 }
 0xdb1   :  { %v2623_v24 = vsel %vm193_vm2, %v2161_v23, -inf }
 0xdb2   :  { %2624 = vmax.xlane.f32.xlu1 %v2623_v24 }
 0xe12   :  { %v2236_v25 = vpop.f32.mrb[30].mxu1 }
 0xe13   :  { %v2237_v39 = vadd.f32 %v2236_v25, %v4844_v63  ;;  %v4240_v27 = vpop.f32.mrb[31].mxu1 }
 0xe15   :  { %v2626_v31 = vsel %vm193_vm2, %v2237_v39, -inf }
 0xe16   :  { %2627 = vmax.xlane.f32.xlu0 %v2626_v31  ;;  %v2312_v32 = vpop.f32.mrb[32].mxu1 }
 0xe17   :  { %v2313_v33 = vadd.f32 %v2312_v32, %v4844_v63  ;;  %v4245_v53 = vpop.f32.mrb[33].mxu1 }
 0xe19   :  { %v2629_v34 = vsel %vm193_vm2, %v2313_v33, -inf }
 0xe1a   :  { %2630 = vmax.xlane.f32.xlu0 %v2629_v34  ;;  %v2388_v35 = vpop.f32.mrb[34].mxu1  ;;  %v2540_v36 = vpop.f32.mrb[16].mxu0 }
 0xe1b   :  { %v2389_v37 = vadd.f32 %v2388_v35, %v4844_v63  ;;  %v4250_v40 = vpop.f32.mrb[35].mxu1  ;;  %v4260_v41 = vpop.f32.mrb[17].mxu0  ;;  %v2541_v43 = vadd.f32 %v2540_v36, %v4844_v63 }
 0xe1d   :  { %v2632_v44 = vsel %vm193_vm2, %v2389_v37, -inf  ;;  %v2638_v0 = vsel %vm193_vm2, %v2541_v43, -inf }
 0xe1e   :  { %2633 = vmax.xlane.f32.xlu0 %v2632_v44  ;;  %v2464_v46 = vpop.f32.mrb[36].mxu1 }
 0xe1f   :  { %v2465_v47 = vadd.f32 %v2464_v46, %v4844_v63  ;;  %v4255_v1 = vpop.f32.mrb[37].mxu1 }
 0xe21   :  { %v2635_v48 = vsel %vm193_vm2, %v2465_v47, -inf }
 0xe22   :  { %2636 = vmax.xlane.f32.xlu1 %v2635_v48  ;;  %v2616_v49 = vpop.f32.mrb[38].mxu1  ;;  %2639 = vmax.xlane.f32.xlu0 %v2638_v0 }
 0xe23   :  { %v2617_v51 = vadd.f32 %v2616_v49, %v4844_v63  ;;  %v4265_v52 = vpop.f32.mrb[39].mxu1 }
 0xe25   :  { %v2641_v54 = vsel %vm193_vm2, %v2617_v51, -inf }
 0xe26   :  { %2642 = vmax.xlane.f32.xlu1 %v2641_v54 }
 0xe37   :  { %2784 = vrot.lane.b32.xlu1 %v5095_v58, %s4630_s12 }
 0xe38   :  { %2708 = vrot.lane.b32.xlu0 %v5097_v60, %s4630_s12  ;;  %v2622_v63 = vpop.xlane.xlu0 %2621 }
 0xe39   :  { %v2644_v55 = vsub.f32 %v2085_v20, %v2622_v63 }
 0xe3b   :  { %2860 = vrot.lane.b32.xlu1 %v5119_v62, %s4630_s12  ;;  %v2652_v56 = vmul.f32 1.442695, %v2644_v55 }
 0xe3c   :  { %3012 = vrot.lane.b32.xlu0 %v5123_v2, %s4630_s12 }
 0xe3d   :  { %4555 = vpow2.f32 %v2652_v56 }
 0xe3f   :  { %2936 = vrot.lane.b32.xlu1 %v5115_v61, %s4630_s12  ;;  %v2625_v57 = vpop.xlane.xlu1 %2624 }
 0xe40   :  { %v2645_v58 = vsub.f32 %v2161_v23, %v2625_v57 }
 0xe42   :  { %v2654_v59 = vmul.f32 1.442695, %v2645_v58 }
 0xe43   :  { %3088 = vrot.lane.b32.xlu1 %v5129_v4, %s4630_s12 }
 0xe44   :  { %4557 = vpow2.f32 %v2654_v59 }
 0xe47   :  { %v5215_v60 = vpop.eup %4555 }
 0xe48   :  { %v2668_v62 = vsel %vm193_vm2, %v5215_v60, 0.0 }
 0xe4e   :  { %v5219_v2 = vpop.eup %4557 }
 0xe4f   :  { %v2671_v61 = vsel %vm193_vm2, %v5219_v2, 0.0 }
 0xe5b   :  { %2669 = vadd.xlane.f32.xlu0 %v2668_v62 }
 0xe67   :  { %2672 = vadd.xlane.f32.xlu1 %v2671_v61 }
 0xea3   :  { %v2628_v4 = vpop.xlane.xlu0 %2627 }
 0xea4   :  { %v2646_v5 = vsub.f32 %v2237_v39, %v2628_v4 }
 0xea6   :  { %v2656_v9 = vmul.f32 1.442695, %v2646_v5 }
 0xea7   :  { %v2631_v11 = vpop.xlane.xlu0 %2630 }
 0xea8   :  { %4559 = vpow2.f32 %v2656_v9  ;;  %v2647_v12 = vsub.f32 %v2313_v33, %v2631_v11 }
 0xeaa   :  { %v2658_v13 = vmul.f32 1.442695, %v2647_v12 }
 0xeab   :  { %v2634_v14 = vpop.xlane.xlu0 %2633 }
 0xeac   :  { %4561 = vpow2.f32 %v2658_v13  ;;  %v2648_v15 = vsub.f32 %v2389_v37, %v2634_v14 }
 0xeae   :  { %v2660_v38 = vmul.f32 1.442695, %v2648_v15 }
 0xeaf   :  { %v2637_v18 = vpop.xlane.xlu1 %2636  ;;  %v2640_v19 = vpop.xlane.xlu0 %2639 }
 0xeb0   :  { %v2649_v20 = vsub.f32 %v2465_v47, %v2637_v18  ;;  %v2650_v29 = vsub.f32 %v2541_v43, %v2640_v19 }
 0xeb2   :  { %v4560_v21 = vpop.eup %4559  ;;  %v2662_v22 = vmul.f32 1.442695, %v2649_v20  ;;  %v2664_v23 = vmul.f32 1.442695, %v2650_v29 }
 0xeb3   :  { %v2643_v24 = vpop.xlane.xlu1 %2642  ;;  %v2709_v25 = vpop.permute.xlu0 %2708  ;;  %v2674_v39 = vsel %vm193_vm2, %v4560_v21, 0.0 }
 0xeb4   :  { %4563 = vpow2.f32 %v2662_v22  ;;  %v2651_v27 = vsub.f32 %v2617_v51, %v2643_v24  ;;  %2675 = vadd.xlane.f32.xlu0 %v2674_v39  ;;  %4267 = vmatpush3.msra.mxu0 %v2709_v25 }
 0xeb5   :  { %4565 = vpow2.f32 %v2664_v23  ;;  %4276 = vmatprep.subr.mxu0 %v4623_v42  ;;  %v3893_v23 = vld [vmem:[%s5424_s4 + $0x20] sm:$0xff] }
 0xeb6   :  { %v4562_v31 = vpop.eup %4561  ;;  %v2666_v32 = vmul.f32 1.442695, %v2651_v27  ;;  %4567 = vpow2.f32 %v2660_v38  ;;  %v3894_v38 = vld [vmem:[%s5424_s4 + $0x28] sm:$0xff]  ;;  %v3895_v27 = vld [vmem:[%s5424_s4 + $0x30] sm:$0xff] }
 0xeb7   :  { %v2785_v33 = vpop.permute.xlu1 %2784  ;;  %v2677_v53 = vsel %vm193_vm2, %v4562_v31, 0.0  ;;  %v3013_v46 = vpop.permute.xlu0 %3012  ;;  %v4438_v24 = vpack.c.bf16 %v3894_v38, %v3893_v23 }
 0xeb8   :  { %4569 = vpow2.f32 %v2666_v32  ;;  %4272 = vmatpush3.msra.mxu1 %v2785_v33  ;;  %2678 = vadd.xlane.f32.xlu1 %v2677_v53 }
 0xeb9   :  { %4281 = vmatprep.subr.mxu1 %v4623_v42 }
 0xebb   :  { %v2861_v47 = vpop.permute.xlu1 %2860 }
 0xebe   :  { %v4564_v34 = vpop.eup %4563 }
 0xebf   :  { %v5227_v35 = vpop.eup %4565  ;;  %v2683_v36 = vsel %vm193_vm2, %v4564_v34, 0.0  ;;  %v2937_v48 = vpop.permute.xlu1 %2936 }
 0xec0   :  { %2684 = vadd.xlane.f32.xlu1 %v2683_v36  ;;  %v2686_v37 = vsel %vm193_vm2, %v5227_v35, 0.0  ;;  %v4568_v40 = vpop.eup %4567 }
 0xec1   :  { %2687 = vadd.xlane.f32.xlu0 %v2686_v37  ;;  %v2680_v44 = vsel %vm193_vm2, %v4568_v40, 0.0 }
 0xec2   :  { %v4570_v41 = vpop.eup %4569 }
 0xec3   :  { %v2689_v43 = vsel %vm193_vm2, %v4570_v41, 0.0  ;;  %v3089_v0 = vpop.permute.xlu1 %3088 }
 0xec4   :  { %2690 = vadd.xlane.f32.xlu1 %v2689_v43 }
 0xec5   :  { %2681 = vadd.xlane.f32.xlu0 %v2680_v44 }
 0xed5   :  { %3240 = vrot.lane.b32.xlu1 %v5137_v6, %s4630_s12 }
 0xedb   :  { %3164 = vrot.lane.b32.xlu0 %v5125_v3, %s4630_s12 }
 0xee8   :  { %v2670_v1 = vpop.xlane.xlu0 %2669 }
 0xee9   :  { %4571 = vrcp.f32 %v2670_v1 }
 0xef3   :  { %v4572_v49 = vpop.eup %4571 }
 0xef4   :  { %v2693_v51 = vmul.f32 %v4572_v49, %v5215_v60  ;;  %v2673_v52 = vpop.xlane.xlu1 %2672 }
 0xef5   :  { %4573 = vrcp.f32 %v2673_v52 }
 0xef6   :  { %4269 = vmatmul.mubr.msk.f32.vlgmr.msra.gmra.mrb[18].mxu0 %vm193_vm2, %v2693_v51 }
 0xef7   :  { %4277 = vmatpush3.msra.mxu0 %v2861_v47  ;;  %4278 = vmatprep.mubr.msk.f32.mxu0 %vm4624_vm1, %v4623_v42 }
 0xef8   :  { %4286 = vmatprep.subr.mxu0 %v4623_v42 }
 0xeff   :  { %v4574_v3 = vpop.eup %4573 }
 0xf00   :  { %v2695_v6 = vmul.f32 %v4574_v3, %v5219_v2 }
 0xf02   :  { %4274 = vmatmul.mubr.msk.f32.vlgmr.msra.gmra.mrb[40].mxu1 %vm193_vm2, %v2695_v6 }
 0xf03   :  { %4282 = vmatpush3.msra.mxu1 %v2937_v48  ;;  %4283 = vmatprep.mubr.msk.f32.mxu1 %vm4624_vm1, %v4623_v42 }
 0xf04   :  { %4291 = vmatprep.subr.mxu1 %v4623_v42 }
 0xf41   :  { %v2676_v54 = vpop.xlane.xlu0 %2675 }
 0xf42   :  { %4575 = vrcp.f32 %v2676_v54  ;;  %v3354_v54 = vrot.slane %v5082_v45, %v1534_v50 }
 0xf45   :  { %v2679_v63 = vpop.xlane.xlu1 %2678 }
 0xf46   :  { %4577 = vrcp.f32 %v2679_v63 }
 0xf4c   :  { %v4576_v55 = vpop.eup %4575 }
 0xf4d   :  { %v2697_v56 = vmul.f32 %v4576_v55, %v4560_v21  ;;  %v2685_v57 = vpop.xlane.xlu1 %2684 }
 0xf4e   :  { %4579 = vrcp.f32 %v2685_v57  ;;  %v2688_v58 = vpop.xlane.xlu0 %2687 }
 0xf4f   :  { %4279 = vmatmul.mubr.msk.f32.vlgmr.msra.gmra.mrb[20].mxu0 %vm193_vm2, %v2697_v56 }
 0xf50   :  { %v4578_v59 = vpop.eup %4577  ;;  %4287 = vmatpush3.msra.mxu0 %v3013_v46  ;;  %4288 = vmatprep.mubr.msk.f32.mxu0 %vm4624_vm1, %v4623_v42 }
 0xf51   :  { %v2699_v60 = vmul.f32 %v4578_v59, %v4562_v31  ;;  %v2691_v62 = vpop.xlane.xlu1 %2690  ;;  %4296 = vmatprep.subr.mxu0 %v4623_v42  ;;  %v3896_v31 = vld [vmem:[%s5424_s4 + $0x38] sm:$0xff] }
 0xf52   :  { %4581 = vrcp.f32 %v2691_v62  ;;  %v2682_v2 = vpop.xlane.xlu0 %2681  ;;  %v4442_v32 = vpack.c.bf16 %v3896_v31, %v3895_v27  ;;  %v3467_v27 = vrot.slane %v5082_v45, %v1647_v7  ;;  %v3909_v7 = vld [vmem:[%s5427_s7 + $0x90] sm:$0xff] }
 0xf53   :  { %4583 = vrcp.f32 %v2682_v2  ;;  %4284 = vmatmul.mubr.msk.f32.vlgmr.msra.gmra.mrb[42].mxu1 %vm193_vm2, %v2699_v60 }
 0xf54   :  { %4292 = vmatpush3.msra.mxu1 %v3089_v0  ;;  %4293 = vmatprep.mubr.msk.f32.mxu1 %vm4624_vm1, %v4623_v42  ;;  %4585 = vrcp.f32 %v2688_v58 }
 0xf55   :  { %4301 = vmatprep.subr.mxu1 %v4623_v42  ;;  %v3241_v5 = vpop.permute.xlu1 %3240 }
 0xf56   :  { %v3165_v15 = vpop.permute.xlu0 %3164 }
 0xf58   :  { %v4580_v61 = vpop.eup %4579 }
 0xf59   :  { %v2703_v4 = vmul.f32 %v4580_v61, %v4564_v34 }
 0xf5b   :  { %4294 = vmatmul.mubr.msk.f32.vlgmr.msra.gmra.mrb[44].mxu1 %vm193_vm2, %v2703_v4 }
 0xf5c   :  { %v4582_v9 = vpop.eup %4581  ;;  %4302 = vmatpush3.msra.mxu1 %v3241_v5  ;;  %4303 = vmatprep.mubr.msk.f32.mxu1 %vm4624_vm1, %v4623_v42 }
 0xf5d   :  { %v4584_v11 = vpop.eup %4583  ;;  %v2707_v12 = vmul.f32 %v4582_v9, %v4570_v41 }
 0xf5e   :  { %v2701_v13 = vmul.f32 %v4584_v11, %v4568_v40  ;;  %v4586_v14 = vpop.eup %4585 }
 0xf5f   :  { %4304 = vmatmul.mubr.msk.f32.vlgmr.msra.gmra.mrb[46].mxu1 %vm193_vm2, %v2707_v12  ;;  %v2705_v18 = vmul.f32 %v4586_v14, %v5227_v35  ;;  %v3900_v14 = vld [vmem:[%s5425_s5 + $0x28] sm:$0xff] }
 0xf60   :  { %4289 = vmatmul.mubr.msk.f32.vlgmr.msra.gmra.mrb[22].mxu0 %vm193_vm2, %v2701_v13  ;;  %v3899_v13 = vld [vmem:[%s5425_s5 + $0x20] sm:$0xff] }
 0xf61   :  { %4297 = vmatpush3.msra.mxu0 %v3165_v15  ;;  %4298 = vmatprep.mubr.msk.f32.mxu0 %vm4624_vm1, %v4623_v42  ;;  %v4446_v15 = vpack.c.bf16 %v3900_v14, %v3899_v13 }
 0xf62   :  { %4439 = vmatprep.subr.bf16.mxu0 %v4438_v24 }
 0xf63   :  { %4447 = vmatprep.subr.bf16.mxu1 %v4446_v15 }
 0xf64   :  { %4299 = vmatmul.mubr.msk.f32.vlgmr.msra.gmra.mrb[24].mxu0 %vm193_vm2, %v2705_v18  ;;  %4449 = vmatpush3.bf16.msra.mxu1 %v4446_v15  ;;  %v3901_v18 = vld [vmem:[%s5425_s5 + $0x30] sm:$0xff] }
 0xf65   :  { %4441 = vmatpush3.bf16.msra.mxu0 %v4438_v24 }
 0xf66   :  { %4443 = vmatprep.subr.bf16.mxu0 %v4442_v32 }
 0xf69   :  { %4445 = vmatpush3.bf16.msra.mxu0 %v4442_v32 }
 0xfc9   :  { %v2780_v19 = vpop.f32.mrb[18].mxu0 }
 0xfca   :  { %v4270_v20 = vpop.f32.mrb[19].mxu0 }
 0xfd5   :  { %v2856_v29 = vpop.f32.mrb[40].mxu1 }
 0xfd6   :  { %v4275_v21 = vpop.f32.mrb[41].mxu1 }
 0xfd7   :  { %v3908_v21 = vld [vmem:[%s5427_s7 + $0x88] sm:$0xff] }
0x1022   :  { %v2932_v22 = vpop.f32.mrb[20].mxu0 }
0x1023   :  { %3318 = vrot.lane.b32.xlu0 %v2932_v22, %s4631_s20  ;;  %v4280_v42 = vpop.f32.mrb[21].mxu0 }
0x1026   :  { %v3008_v25 = vpop.f32.mrb[42].mxu1 }
0x1027   :  { %3320 = vrot.lane.b32.xlu1 %v3008_v25, %s4631_s20  ;;  %v4285_v39 = vpop.f32.mrb[43].mxu1 }
0x102e   :  { %v3160_v33 = vpop.f32.mrb[44].mxu1 }
0x102f   :  { %3328 = vrot.lane.b32.xlu1 %v3160_v33, %s4632_s21  ;;  %v4295_v53 = vpop.f32.mrb[45].mxu1  ;;  %v3473_v33 = vrot.slane %v5082_v45, %v1653_v8  ;;  %v3911_v8 = vld [vmem:[%s5427_s7 + $0xa0] sm:$0xff] }
0x1032   :  { %v3312_v34 = vpop.f32.mrb[46].mxu1 }
0x1033   :  { %v3084_v35 = vpop.f32.mrb[22].mxu0  ;;  %3336 = vrot.lane.b32.xlu1 %v3312_v34, %s4633_s22  ;;  %v4305_v36 = vpop.f32.mrb[47].mxu1 }
0x1034   :  { %3326 = vrot.lane.b32.xlu0 %v3084_v35, %s4632_s21  ;;  %v4290_v37 = vpop.f32.mrb[23].mxu0 }
0x1037   :  { %v3236_v40 = vpop.f32.mrb[24].mxu0 }
0x1038   :  { %3334 = vrot.lane.b32.xlu0 %v3236_v40, %s4633_s22  ;;  %v4300_v41 = vpop.f32.mrb[25].mxu0 }
0x1039   :  { %v3910_v41 = vld [vmem:[%s5427_s7 + $0x98] sm:$0xff] }
0x1095   :  { %v3319_v44 = vpop.permute.xlu0 %3318 }
0x1096   :  { %v3340_v1 = vsel %vm193_vm2, %v2780_v19, %v3319_v44  ;;  %v3902_v19 = vld [vmem:[%s5425_s5 + $0x38] sm:$0xff]  ;;  %v3912_v44 = vld [vmem:[%s5427_s7 + $0xa8] sm:$0xff] }
0x1097   :  { %v4450_v20 = vpack.c.bf16 %v3902_v19, %v3901_v18 }
0x1099   :  { %v3321_v43 = vpop.permute.xlu1 %3320  ;;  %4451 = vmatprep.subr.bf16.mxu1 %v4450_v20 }
0x109a   :  { %v3341_v0 = vsel %vm193_vm2, %v2856_v29, %v3321_v43  ;;  %4453 = vmatpush3.bf16.msra.mxu1 %v4450_v20  ;;  %v3907_v29 = vld [vmem:[%s5427_s7 + $0x80] sm:$0xff]  ;;  %v4458_v43 = vpack.c.bf16 %v3910_v41, %v3909_v7 }
0x109b   :  { %v4454_v22 = vpack.c.bf16 %v3908_v21, %v3907_v29 }
0x109d   :  { %4455 = vmatprep.subr.bf16.mxu0 %v4454_v22 }
0x10a1   :  { %v3329_v46 = vpop.permute.xlu1 %3328 }
0x10a2   :  { %v3343_v52 = vsel %vm1522_vm4, %v3341_v0, %v3329_v46  ;;  %v4462_v46 = vpack.c.bf16 %v3912_v44, %v3911_v8  ;;  %v3915_v0 = vld [vmem:[%s5427_s7 + $0xc0] sm:$0xff]  ;;  %v3727_v44 = vld [vmem:[%s5429_s9 + $0x10] sm:$0xff] }
0x10a5   :  { %v3337_v48 = vpop.permute.xlu1 %3336 }
0x10a6   :  { %v3327_v47 = vpop.permute.xlu0 %3326  ;;  %v3345_v6 = vsel %vm1525_vm5, %v3343_v52, %v3337_v48  ;;  %v3917_v52 = vld [vmem:[%s5427_s7 + $0xd0] sm:$0xff] }
0x10a7   :  { %v3342_v49 = vsel %vm1522_vm4, %v3340_v1, %v3327_v47  ;;  %v3913_v47 = vld [vmem:[%s5427_s7 + $0xb0] sm:$0xff]  ;;  %v3914_v1 = vld [vmem:[%s5427_s7 + $0xb8] sm:$0xff] }
0x10a8   :  { %v4466_v48 = vpack.c.bf16 %v3914_v1, %v3913_v47 }
0x10aa   :  { %v3335_v51 = vpop.permute.xlu0 %3334 }
0x10ab   :  { %v3344_v3 = vsel %vm1525_vm5, %v3342_v49, %v3335_v51  ;;  %v3916_v49 = vld [vmem:[%s5427_s7 + $0xc8] sm:$0xff] }
0x10ac   :  { %4314 = vmatprep.mubr.msk.f32.mxu0 %vm45_vm0, %v3344_v3  ;;  %v4470_v51 = vpack.c.bf16 %v3916_v49, %v3915_v0  ;;  %v3918_v3 = vld [vmem:[%s5427_s7 + $0xd8] sm:$0xff] }
0x10ad   :  { %4315 = vmatmul.mubr.msk.f32.vlgmr.msra.gmra.mrb[26].mxu0 %vm45_vm0, %v3345_v6  ;;  %v4474_v6 = vpack.c.bf16 %v3918_v3, %v3917_v52  ;;  %v3686_v3 = vld [vmem:[%s5428_s8] sm:$0x3] }
0x10ae   :  { %4457 = vmatpush3.bf16.msra.mxu0 %v4454_v22 }
0x10af   :  { %4459 = vmatprep.subr.bf16.mxu0 %v4458_v43 }
0x10b2   :  { %4461 = vmatpush3.bf16.msra.mxu0 %v4458_v43  ;;  %v3726_v43 = vld [vmem:[%s5429_s9 + $0x8] sm:$0xff] }
0x10b3   :  { %4463 = vmatprep.subr.bf16.mxu0 %v4462_v46 }
0x10b6   :  { %4465 = vmatpush3.bf16.msra.mxu0 %v4462_v46  ;;  %v3728_v46 = vld [vmem:[%s5429_s9 + $0x18] sm:$0xff] }
0x10b7   :  { %4467 = vmatprep.subr.bf16.mxu0 %v4466_v48  ;;  %v4490_v47 = vpack.c.bf16 %v3728_v46, %v3727_v44 }
0x10ba   :  { %4469 = vmatpush3.bf16.msra.mxu0 %v4466_v48 }
0x10bb   :  { %4471 = vmatprep.subr.bf16.mxu0 %v4470_v51 }
0x10be   :  { %4473 = vmatpush3.bf16.msra.mxu0 %v4470_v51 }
0x10bf   :  { %4475 = vmatprep.subr.bf16.mxu0 %v4474_v6 }
0x10c2   :  { %4477 = vmatpush3.bf16.msra.mxu0 %v4474_v6  ;;  %v3716_v6 = vrot.slane %v3686_v3, %v4725_v28 }
0x1180   :  { %v4316_v63 = vpop.f32.mrb[26].mxu0 }
0x1181   :  { %v3433_v55 = vadd.f32 %v4316_v63, %v3354_v54  ;;  %v3427_v56 = vpop.f32.mrb[27].mxu0  ;;  %v3920_v63 = vld [vmem:[%s5427_s7 + $0xe8] sm:$0xff] }
0x1182   :  { %v3428_v57 = vadd.f32 %v3427_v56, %v3354_v54  ;;  %v3919_v54 = vld [vmem:[%s5427_s7 + $0xe0] sm:$0xff]  ;;  %v3921_v56 = vld [vmem:[%s5427_s7 + $0xf0] sm:$0xff] }
0x1183   :  { %v5295_v58 = vadd.f32 %v3433_v55, %v5053_v16  ;;  %v4478_v55 = vpack.c.bf16 %v3920_v63, %v3919_v54 }
0x1184   :  { %v5298_v59 = vadd.f32 %v3428_v57, %v5056_v17  ;;  %v3922_v57 = vld [vmem:[%s5427_s7 + $0xf8] sm:$0xff] }
0x1185   :  { %v3441_v60 = vsel %vm45_vm0, %v5295_v58, 0.0  ;;  %4479 = vmatprep.subr.bf16.mxu0 %v4478_v55 }
0x1186   :  { %3442 = vadd.xlane.f32.xlu1 %v3441_v60  ;;  %v3438_v62 = vsel %vm45_vm0, %v5298_v59, 0.0  ;;  %v4482_v60 = vpack.c.bf16 %v3922_v57, %v3921_v56  ;;  %4481 = vmatpush3.bf16.msra.mxu0 %v4478_v55  ;;  %v3722_v57 = vrot.slane %v3686_v3, %v4733_v30 }
0x1187   :  { %3439 = vadd.xlane.f32.xlu0 %v3438_v62  ;;  %v3904_v62 = vld [vmem:[%s5426_s6 + $0x1] ss:$0 sm:$0xff] }
0x1188   :  { %4483 = vmatprep.subr.bf16.mxu0 %v4482_v60 }
0x118a   :  { %4485 = vmatpush3.bf16.msra.mxu0 %v4482_v60 }
0x1213   :  { %v3443_v2 = vpop.xlane.xlu1 %3442 }
0x1214   :  { %v3445_v50 = vmul.f32 0.03125, %v3443_v2  ;;  %v3440_v61 = vpop.xlane.xlu0 %3439 }
0x1215   :  { %v3444_v4 = vmul.f32 0.03125, %v3440_v61 }
0x1216   :  { %v3447_v5 = vsub.f32 %v5295_v58, %v3445_v50 }
0x1217   :  { %v3446_v16 = vsub.f32 %v5298_v59, %v3444_v4 }
0x1218   :  { %v3449_v11 = vmul.f32 %v3447_v5, %v3447_v5 }
0x1219   :  { %v3448_v9 = vmul.f32 %v3446_v16, %v3446_v16 }
0x121a   :  { %v3453_v12 = vsel %vm45_vm0, %v3449_v11, 0.0 }
0x121b   :  { %v3450_v17 = vsel %vm45_vm0, %v3448_v9, 0.0 }
0x121c   :  { %3451 = vadd.xlane.f32.xlu0 %v3450_v17 }
0x1220   :  { %3454 = vadd.xlane.f32.xlu0 %v3453_v12 }
0x12a9   :  { %v3452_v23 = vpop.xlane.xlu0 %3451 }
0x12aa   :  { %v3456_v38 = vmul.f32 0.03125, %v3452_v23 }
0x12ac   :  { %v3458_v42 = vadd.f32 1e-05, %v3456_v38 }
0x12ad   :  { %v3455_v24 = vpop.xlane.xlu0 %3454 }
0x12ae   :  { %4587 = vrsqrt.f32 %v3458_v42  ;;  %v3457_v25 = vmul.f32 0.03125, %v3455_v24  ;;  %v3608_v24 = vrot.slane %v5082_v45, %v1785_v10 }
0x12b0   :  { %v3459_v39 = vadd.f32 1e-05, %v3457_v25 }
0x12b2   :  { %4589 = vrsqrt.f32 %v3459_v39 }
0x12b8   :  { %v4588_v31 = vpop.eup %4587 }
0x12b9   :  { %v3462_v32 = vmul.f32 %v4588_v31, %v3446_v16 }
0x12bb   :  { %v3468_v53 = vmul.f32 %v3467_v27, %v3462_v32 }
0x12bc   :  { %v4590_v34 = vpop.eup %4589 }
0x12bd   :  { %v3463_v35 = vmul.f32 %v4590_v34, %v3447_v5  ;;  %v3474_v36 = vadd.f32 %v3473_v33, %v3468_v53 }
0x12bf   :  { %v3469_v37 = vmul.f32 %v3467_v27, %v3463_v35  ;;  %4325 = vmatprep.mubr.msk.f32.mxu1 %vm45_vm0, %v3474_v36 }
0x12c1   :  { %v3475_v40 = vadd.f32 %v3473_v33, %v3469_v37 }
0x12c3   :  { %4326 = vmatmul.mubr.msk.f32.vlgmr.msra.gmra.mrb[48].mxu1 %vm45_vm0, %v3475_v40 }
0x1396   :  { %v4327_v2 = vpop.f32.mrb[48].mxu1 }
0x1397   :  { %v3567_v50 = vadd.f32 %v4327_v2, %v3904_v62  ;;  %v3561_v61 = vpop.f32.mrb[49].mxu1 }
0x1398   :  { %v3562_v4 = vadd.f32 %v3904_v62, %v3561_v61 }
0x1399   :  { %v3573_v5 = vmul.f32 0.044715, %v3567_v50  ;;  %v3571_v23 = vmul.f32 0.5, %v3567_v50 }
0x139a   :  { %v3572_v16 = vmul.f32 0.044715, %v3562_v4  ;;  %v3570_v21 = vmul.f32 0.5, %v3562_v4 }
0x139b   :  { %v3575_v9 = vmul.f32 %v3573_v5, %v3567_v50 }
0x139c   :  { %v3574_v17 = vmul.f32 %v3572_v16, %v3562_v4 }
0x139d   :  { %v3577_v11 = vmul.f32 %v3575_v9, %v3567_v50 }
0x139e   :  { %v3576_v12 = vmul.f32 %v3574_v17, %v3562_v4 }
0x139f   :  { %v3579_v13 = vadd.f32 %v3577_v11, %v3567_v50 }
0x13a0   :  { %v3578_v14 = vadd.f32 %v3576_v12, %v3562_v4 }
0x13a1   :  { %v3581_v15 = vmul.f32 0.7978846, %v3579_v13 }
0x13a2   :  { %v3580_v18 = vmul.f32 0.7978846, %v3578_v14 }
0x13a3   :  { %4591 = vtanh.f32 %v3581_v15 }
0x13a4   :  { %4593 = vtanh.f32 %v3580_v18 }
0x13ad   :  { %v4592_v19 = vpop.eup %4591 }
0x13ae   :  { %v4594_v20 = vpop.eup %4593  ;;  %v3585_v29 = vadd.f32 1.0, %v4592_v19 }
0x13af   :  { %v3584_v22 = vadd.f32 1.0, %v4594_v20 }
0x13b0   :  { %v3587_v42 = vmul.f32 %v3585_v29, %v3571_v23 }
0x13b1   :  { %v3586_v38 = vmul.f32 %v3584_v22, %v3570_v21 }
0x13b3   :  { %4360 = vmatprep.mubr.f32.mxu0 %v3586_v38 }
0x13b4   :  { %4361 = vmatmul.mubr.f32.vlgmr.msra.gmra.mrb[28].mxu0 %v3587_v42 }
0x1487   :  { %v4362_v25 = vpop.f32.mrb[28].mxu0 }
0x1488   :  { %v3681_v39 = vadd.f32 %v4362_v25, %v3608_v24  ;;  %v3675_v27 = vpop.f32.mrb[29].mxu0 }
0x1489   :  { %v3676_v31 = vadd.f32 %v3675_v27, %v3608_v24 }
0x148a   :  { %v3685_v32 = vadd.f32 %v3681_v39, %v5295_v58 }
0x148b   :  { %v3684_v33 = vadd.f32 %v3676_v31, %v5298_v59  ;;  %v3725_v59 = vld [vmem:[%s5429_s9] sm:$0xff]  ;;  %s4634_s9 = smov [#allocation2]  }
0x148c   :  { %v3690_v53 = vsel %vm45_vm0, %v3685_v32, 0.0  ;;  %v4486_v8 = vpack.c.bf16 %v3726_v43, %v3725_v59  ;;  %s3817_s4 = sshll.u32 %s4634_s9, 4  ;;  %s3818_s4 = int_to_ptr.vmem [resolvable:$true] %s3817_s4 }
0x148d   :  { %3691 = vadd.xlane.f32.xlu1 %v3690_v53  ;;  %v3687_v34 = vsel %vm45_vm0, %v3684_v33, 0.0  ;;  %s4599_s8 = scalar_lea.vmem %s3818_s4, 256  ;;  %p4604_p1 = scmp.lt.s32.totalorder %s3818_s4, %s3818_s4 }
0x148e   :  { %3688 = vadd.xlane.f32.xlu0 %v3687_v34  ;;  %4487 = vmatprep.subr.bf16.mxu1 %v4486_v8  ;;  %p4600_p0 = scmp.ne.s32.totalorder %s3818_s4, %s4599_s8  ;;  %p4605_p2 = scmp.lt.s32.totalorder %s4599_s8, %s4599_s8 }
0x148f   :  { %4489 = vmatpush3.bf16.msra.mxu1 %v4486_v8 }
0x1490   :  { %4491 = vmatprep.subr.bf16.mxu1 %v4490_v47  ;;  %p4606_p3 = por %p4605_p2, %p4604_p1 }
0x1492   :  { %p4607_p4 = pnand %p4606_p3, %p4600_p0 }
0x1493   :  { %4493 = vmatpush3.bf16.msra.mxu1 %v4490_v47 }
0x151a   :  { %v3692_v35 = vpop.xlane.xlu1 %3691 }
0x151b   :  { %v3694_v36 = vmul.f32 0.03125, %v3692_v35  ;;  %v3689_v37 = vpop.xlane.xlu0 %3688 }
0x151c   :  { %v3693_v26 = vmul.f32 0.03125, %v3689_v37 }
0x151d   :  { %v3696_v40 = vsub.f32 %v3685_v32, %v3694_v36 }
0x151e   :  { %v3695_v10 = vsub.f32 %v3684_v33, %v3693_v26 }
0x151f   :  { %v3698_v45 = vmul.f32 %v3696_v40, %v3696_v40 }
0x1520   :  { %v3697_v7 = vmul.f32 %v3695_v10, %v3695_v10 }
0x1521   :  { %v3702_v41 = vsel %vm45_vm0, %v3698_v45, 0.0 }
0x1522   :  { %3703 = vadd.xlane.f32.xlu1 %v3702_v41  ;;  %v3699_v58 = vsel %vm45_vm0, %v3697_v7, 0.0 }
0x1523   :  { %3700 = vadd.xlane.f32.xlu0 %v3699_v58 }
0x15af   :  { %v3704_v1 = vpop.xlane.xlu1 %3703 }
0x15b0   :  { %v3706_v48 = vmul.f32 0.03125, %v3704_v1  ;;  %v3701_v0 = vpop.xlane.xlu0 %3700 }
0x15b1   :  { %v3705_v49 = vmul.f32 0.03125, %v3701_v0 }
0x15b2   :  { %v3708_v51 = vadd.f32 1e-05, %v3706_v48 }
0x15b3   :  { %v3707_v52 = vadd.f32 1e-05, %v3705_v49 }
0x15b4   :  { %4595 = vrsqrt.f32 %v3708_v51 }
0x15b5   :  { %4597 = vrsqrt.f32 %v3707_v52 }
0x15be   :  { %v4596_v54 = vpop.eup %4595 }
0x15bf   :  { %v4598_v63 = vpop.eup %4597  ;;  %v3712_v55 = vmul.f32 %v4596_v54, %v3696_v40 }
0x15c0   :  { %v3711_v56 = vmul.f32 %v4598_v63, %v3695_v10 }
0x15c1   :  { %v3718_v60 = vmul.f32 %v3716_v6, %v3712_v55 }
0x15c2   :  { %v3717_v62 = vmul.f32 %v3716_v6, %v3711_v56 }
0x15c3   :  { %v3724_v50 = vadd.f32 %v3722_v57, %v3718_v60 }
0x15c4   :  { %v3723_v2 = vadd.f32 %v3722_v57, %v3717_v62 }
0x15c6   :  { %4371 = vmatprep.mubr.msk.f32.mxu1 %vm45_vm0, %v3723_v2 }
0x15c7   :  { %4372 = vmatmul.mubr.msk.f32.vlgmr.msra.gmra.mrb[50].mxu1 %vm45_vm0, %v3724_v50 }
0x169a   :  { %v4373_v61 = vpop.f32.mrb[50].mxu1 }
0x169b   :  { %3811 = vst [vmem:[#allocation2 + $0x8] sm:$0xff] %v4373_v61  ;;  %v3801_v28 = vpop.f32.mrb[51].mxu1 }
0x169c   :  { %3810 = vst [vmem:[#allocation2] sm:$0xff] %v3801_v28 }
0x169d   :  { %4610 = shalt.err (!%p4607_p4)
}
0x169e   :  { %s4611_s25 = scalar_lea.hbm %s5430_s10, 256 }
0x169f   :  { %p4612_p5 = scmp.ne.s32.totalorder %s5430_s10, %s4611_s25  ;;  %p4615_p6 = scmp.lt.u32.totalorder %s4611_s25, %s5430_s10 }
0x16a1   :  { %p4617_p7 = pnand %p4615_p6, %p4612_p5 }
0x16a3   :  { %4620 = shalt.err (!%p4617_p7)
}
0x16a4   :  { %s4635_s15 = smov 128  }
0x16a5   :  { %3823 = dma.vmem_to_hbm [thread:$0]  %s3818_s4, 256, %s5430_s10, [#allocation3], %s4635_s15, %s4635_s15, %s4631_s20  }
0x16a6   :  { %4621 = dma.done.wait [#allocation3], 256  }
0x16a7   :  { %4622 = vsyncadd [#allocation3], 4294967040 }
0x16a8   :  { %3827 = vsyncpa [#allocation3], 1 }

</bundles_post_ra>
